<compile_context>
chip_gen: v7x
topology: tpu7x:2x2x1
jax: 0.10.0
libtpu: 0.0.40
codegen_flags: <defaults>
</compile_context>

<pallas_src>
import functools

import jax
import jax.numpy as jnp
import numpy as np
from jax import lax
from jax.experimental import pallas as pl
from jax.experimental.pallas import tpu as pltpu


def _round_up(x, m):
    return (x + m - 1) // m * m


# ----------------------------------------------------------------------------
# Fused kernel factory
# ----------------------------------------------------------------------------
def _make_fused_kernel(num_layers, T, Bp, H):
    """Fused multi-layer LSTM + linear head.

    Kernel refs (positional):
      x_ref                      (T*Bp, F0)   time-major, batch-padded, flattened
      per layer l: w_ih_l (F_l, 4H), w_hh_l (H, 4H), b_l (1, 4H)
      head_w                     (H, Opad)
      head_b                     (1, Opad)
      out_ref                    (Bp, Opad)
      seq_ref  (VMEM scratch)    (T*Bp, H)    current layer's hidden sequence
      gx_ref   (VMEM scratch)    (T*Bp, 4H)   hoisted x @ W_ih + b
    """

    def kernel(*args):
        x_ref = args[0]
        layer_refs = args[1:1 + 3 * num_layers]
        head_w_ref = args[1 + 3 * num_layers]
        head_b_ref = args[2 + 3 * num_layers]
        out_ref = args[3 + 3 * num_layers]
        seq_ref = args[4 + 3 * num_layers]
        gx_ref = args[5 + 3 * num_layers]

        h_last = None
        for layer in range(num_layers):
            w_ih = layer_refs[3 * layer][...]
            w_hh = layer_refs[3 * layer + 1][...]
            b = layer_refs[3 * layer + 2][...]

            layer_in = x_ref[...] if layer == 0 else seq_ref[...]

            # Hoisted input projection + bias: one big MXU matmul, off the
            # serial h-dependence chain.
            gx_ref[...] = (
                jnp.dot(layer_in, w_ih, preferred_element_type=jnp.float32) + b
            )

            write_seq = layer < num_layers - 1  # last layer only needs h_T

            def step(t, carry, w_hh=w_hh, write_seq=write_seq):
                h, c = carry
                row = pl.multiple_of(t * Bp, Bp)  # sublane-aligned row block
                gates = gx_ref[pl.ds(row, Bp), :] + jnp.dot(
                    h, w_hh, preferred_element_type=jnp.float32)  # (Bp, 4H)
                i_g = jax.nn.sigmoid(gates[:, 0 * H:1 * H])
                f_g = jax.nn.sigmoid(gates[:, 1 * H:2 * H])
                g_g = jnp.tanh(gates[:, 2 * H:3 * H])
                o_g = jax.nn.sigmoid(gates[:, 3 * H:4 * H])
                c_new = f_g * c + i_g * g_g
                h_new = o_g * jnp.tanh(c_new)
                if write_seq:
                    seq_ref[pl.ds(row, Bp), :] = h_new
                return h_new, c_new

            carry0 = (jnp.zeros((Bp, H), jnp.float32),
                      jnp.zeros((Bp, H), jnp.float32))
            h_last, _ = lax.fori_loop(0, T, step, carry0, unroll=True)

        # Fused head on the final hidden state (lane-dense padded output).
        out_ref[...] = (
            jnp.dot(h_last, head_w_ref[...], preferred_element_type=jnp.float32)
            + head_b_ref[...]
        ).astype(out_ref.dtype)

    return kernel


# ----------------------------------------------------------------------------
# Model: parameter init + forward (mirrors LSTMModelTTT.forward)
# ----------------------------------------------------------------------------
def init_params(key, input_size, hidden_size, num_layers, output_size,
                pretext_output_size):
    """Uniform(-k, k) init, k = 1/sqrt(hidden_size) (PyTorch-like)."""
    k = 1.0 / np.sqrt(hidden_size)
    params = {"lstm": []}
    for layer in range(num_layers):
        fin = input_size if layer == 0 else hidden_size
        key, k1, k2, k3, k4 = jax.random.split(key, 5)
        w_ih = jax.random.uniform(k1, (fin, 4 * hidden_size), jnp.float32, -k, k)
        w_hh = jax.random.uniform(k2, (hidden_size, 4 * hidden_size), jnp.float32, -k, k)
        b_ih = jax.random.uniform(k3, (4 * hidden_size,), jnp.float32, -k, k)
        b_hh = jax.random.uniform(k4, (4 * hidden_size,), jnp.float32, -k, k)
        params["lstm"].append(
            {"w_ih": w_ih, "w_hh": w_hh, "b": (b_ih + b_hh)[None, :]}
        )
    key, k1, k2, k3, k4 = jax.random.split(key, 5)
    kc = 1.0 / np.sqrt(hidden_size)
    params["cls_w"] = jax.random.uniform(k1, (hidden_size, output_size), jnp.float32, -kc, kc)
    params["cls_b"] = jax.random.uniform(k2, (1, output_size), jnp.float32, -kc, kc)
    params["pre_w"] = jax.random.uniform(k3, (hidden_size, pretext_output_size), jnp.float32, -kc, kc)
    params["pre_b"] = jax.random.uniform(k4, (1, pretext_output_size), jnp.float32, -kc, kc)
    return params


@functools.partial(jax.jit, static_argnames=("task",))
def lstm_model_ttt_forward(params, x, task="classification"):
    """x: (B, T, input_size) batch-first, like the PyTorch module."""
    if task == "classification":
        head_w, head_b = params["cls_w"], params["cls_b"]
    elif task == "pretext":
        head_w, head_b = params["pre_w"], params["pre_b"]
    else:
        raise ValueError("Task must be 'classification' or 'pretext'")

    B, T, F = x.shape
    H = params["lstm"][0]["w_hh"].shape[0]
    num_layers = len(params["lstm"])
    out_dim = head_w.shape[1]

    Bp = _round_up(max(B, 8), 8)       # pad batch to f32 sublane count
    out_pad = _round_up(out_dim, 128)  # lane-dense output store

    # time-major, batch-padded, flattened to (T*Bp, F)
    x_tm = jnp.transpose(x, (1, 0, 2)).astype(jnp.float32)   # (T, B, F)
    x_tm = jnp.pad(x_tm, ((0, 0), (0, Bp - B), (0, 0)))       # (T, Bp, F)
    x2d = x_tm.reshape(T * Bp, F)

    head_w_p = jnp.pad(head_w.astype(jnp.float32),
                       ((0, 0), (0, out_pad - out_dim)))
    head_b_p = jnp.pad(head_b.astype(jnp.float32),
                       ((0, 0), (0, out_pad - out_dim)))

    layer_args = []
    in_specs = [pl.BlockSpec((T * Bp, F), lambda: (0, 0))]
    for lp in params["lstm"]:
        fin = lp["w_ih"].shape[0]
        layer_args += [lp["w_ih"], lp["w_hh"], lp["b"]]
        in_specs += [
            pl.BlockSpec((fin, 4 * H), lambda: (0, 0)),
            pl.BlockSpec((H, 4 * H), lambda: (0, 0)),
            pl.BlockSpec((1, 4 * H), lambda: (0, 0)),
        ]
    in_specs += [
        pl.BlockSpec((H, out_pad), lambda: (0, 0)),
        pl.BlockSpec((1, out_pad), lambda: (0, 0)),
    ]

    kernel = _make_fused_kernel(num_layers, T, Bp, H)
    out_padded = pl.pallas_call(
        kernel,
        out_shape=jax.ShapeDtypeStruct((Bp, out_pad), jnp.float32),
        in_specs=in_specs,
        out_specs=pl.BlockSpec((Bp, out_pad), lambda: (0, 0)),
        scratch_shapes=[
            pltpu.VMEM((T * Bp, H), jnp.float32),       # hidden sequence
            pltpu.VMEM((T * Bp, 4 * H), jnp.float32),   # hoisted input gates
        ],
    )(x2d, *layer_args, head_w_p, head_b_p)

    return out_padded[:B, :out_dim]


# ----------------------------------------------------------------------------
# Pure-JAX reference (correctness sanity check)
# ----------------------------------------------------------------------------
def reference_forward(params, x, task="classification"):
    h_seq = jnp.transpose(x, (1, 0, 2)).astype(jnp.float32)  # (T, B, F)
    for lp in params["lstm"]:
        T, B, _ = h_seq.shape
        H = lp["w_hh"].shape[0]

        def step(carry, x_t):
            h_prev, c_prev = carry
            gates = x_t @ lp["w_ih"] + h_prev @ lp["w_hh"] + lp["b"]
            i = jax.nn.sigmoid(gates[:, 0 * H:1 * H])
            f = jax.nn.sigmoid(gates[:, 1 * H:2 * H])
            g = jnp.tanh(gates[:, 2 * H:3 * H])
            o = jax.nn.sigmoid(gates[:, 3 * H:4 * H])
            c = f * c_prev + i * g
            h = o * jnp.tanh(c)
            return (h, c), h

        init = (jnp.zeros((B, H), jnp.float32), jnp.zeros((B, H), jnp.float32))
        _, h_seq = jax.lax.scan(step, init, h_seq)
    last = h_seq[-1]
    if task == "classification":
        return last @ params["cls_w"] + params["cls_b"]
    return last @ params["pre_w"] + params["pre_b"]


# ----------------------------------------------------------------------------
if __name__ == "__main__":
    B, T = 2, 8
    input_size, hidden_size, num_layers = 16, 32, 2
    output_size, pretext_output_size = 2, 64

    key = jax.random.PRNGKey(0)
    kp, kx = jax.random.split(key)
    params = init_params(kp, input_size, hidden_size, num_layers,
                         output_size, pretext_output_size)
    x = jax.random.normal(kx, (B, T, input_size), jnp.float32)

    logits = lstm_model_ttt_forward(params, x, task="classification")
    logits = jax.block_until_ready(logits)
    preds = lstm_model_ttt_forward(params, x, task="pretext")
    preds = jax.block_until_ready(preds)

    ref_logits = reference_forward(params, x, task="classification")
    ref_preds = reference_forward(params, x, task="pretext")
    np.testing.assert_allclose(np.asarray(logits), np.asarray(ref_logits),
                               rtol=2e-2, atol=2e-2)
    np.testing.assert_allclose(np.asarray(preds), np.asarray(ref_preds),
                               rtol=2e-2, atol=2e-2)

    assert logits.shape == (B, output_size)
    assert preds.shape == (B, pretext_output_size)
    print("KERNEL_OK")
</pallas_src>

<mosaic_0001>
module attributes {stable_mosaic.version = 11 : i64} {
  func.func @kernel(%arg0: memref<64x16xf32, #tpu.memory_space<vmem>>, %arg1: memref<16x128xf32, #tpu.memory_space<vmem>>, %arg2: memref<32x128xf32, #tpu.memory_space<vmem>>, %arg3: memref<1x128xf32, #tpu.memory_space<vmem>>, %arg4: memref<32x128xf32, #tpu.memory_space<vmem>>, %arg5: memref<32x128xf32, #tpu.memory_space<vmem>>, %arg6: memref<1x128xf32, #tpu.memory_space<vmem>>, %arg7: memref<32x128xf32, #tpu.memory_space<vmem>>, %arg8: memref<1x128xf32, #tpu.memory_space<vmem>>, %arg9: memref<8x128xf32, #tpu.memory_space<vmem>>, %arg10: memref<64x32xf32, #tpu.memory_space<vmem>>, %arg11: memref<64x128xf32, #tpu.memory_space<vmem>>) attributes {dimension_semantics = [], scalar_prefetch = 0 : i64, scratch_operands = 2 : i64, tpu.core_type = #tpu.core_type<tc>} {
    %c0 = arith.constant 0 : index
    %c0_0 = arith.constant 0 : index
    %0 = vector.load %arg1[%c0, %c0_0] : memref<16x128xf32, #tpu.memory_space<vmem>>, vector<16x128xf32>
    %c0_1 = arith.constant 0 : index
    %c0_2 = arith.constant 0 : index
    %1 = vector.load %arg2[%c0_1, %c0_2] : memref<32x128xf32, #tpu.memory_space<vmem>>, vector<32x128xf32>
    %c0_3 = arith.constant 0 : index
    %c0_4 = arith.constant 0 : index
    %2 = vector.load %arg3[%c0_3, %c0_4] : memref<1x128xf32, #tpu.memory_space<vmem>>, vector<1x128xf32>
    %c0_5 = arith.constant 0 : index
    %c0_6 = arith.constant 0 : index
    %3 = vector.load %arg0[%c0_5, %c0_6] : memref<64x16xf32, #tpu.memory_space<vmem>>, vector<64x16xf32>
    %cst = arith.constant dense<0.000000e+00> : vector<64x128xf32>
    %4 = tpu.matmul %3, %0, %cst {dimension_numbers = #tpu.dot_dimension_numbers<[1], [0], [0], [1], [0, 0, 1, 1], [], []>} : vector<64x16xf32>, vector<16x128xf32>, vector<64x128xf32> -> vector<64x128xf32>
    %5 = vector.broadcast %2 : vector<1x128xf32> to vector<64x128xf32>
    %6 = arith.addf %4, %5 : vector<64x128xf32>
    %c0_7 = arith.constant 0 : index
    %c0_8 = arith.constant 0 : index
    %7 = vector.load %arg11[%c0_7, %c0_8] : memref<64x128xf32, #tpu.memory_space<vmem>>, vector<64x128xf32>
    tpu.vector_store %arg11[%c0_7, %c0_8], %6 {strides = array<i32>} : memref<64x128xf32, #tpu.memory_space<vmem>>, vector<64x128xf32>,
    %cst_9 = arith.constant 0.000000e+00 : f32
    %8 = vector.broadcast %cst_9 : f32 to vector<8x32xf32>
    %cst_10 = arith.constant 0.000000e+00 : f32
    %9 = vector.broadcast %cst_10 : f32 to vector<8x32xf32>
    %c0_i32 = arith.constant 0 : i32
    %c8_i32 = arith.constant 8 : i32
    %10 = arith.muli %c0_i32, %c8_i32 : i32
    %11 = tpu.assume_multiple %10, 8 : i32
    %12 = arith.index_cast %11 : i32 to index
    %c0_11 = arith.constant 0 : index
    %13 = vector.load %arg11[%12, %c0_11] : memref<64x128xf32, #tpu.memory_space<vmem>>, vector<8x128xf32>
    %cst_12 = arith.constant dense<0.000000e+00> : vector<8x128xf32>
    %14 = tpu.matmul %8, %1, %cst_12 {dimension_numbers = #tpu.dot_dimension_numbers<[1], [0], [0], [1], [0, 0, 1, 1], [], []>} : vector<8x32xf32>, vector<32x128xf32>, vector<8x128xf32> -> vector<8x128xf32>
    %15 = arith.addf %13, %14 : vector<8x128xf32>
    %16 = vector.extract_strided_slice %15 {offsets = [0, 0], sizes = [8, 32], strides = [1, 1]} : vector<8x128xf32> to vector<8x32xf32>
    %17 = arith.negf %16 : vector<8x32xf32>
    %18 = math.exp %17 : vector<8x32xf32>
    %cst_13 = arith.constant 1.000000e+00 : f32
    %19 = vector.broadcast %cst_13 : f32 to vector<8x32xf32>
    %20 = arith.addf %19, %18 : vector<8x32xf32>
    %21 = arith.divf %19, %20 : vector<8x32xf32>
    %22 = vector.extract_strided_slice %15 {offsets = [0, 32], sizes = [8, 32], strides = [1, 1]} : vector<8x128xf32> to vector<8x32xf32>
    %23 = arith.negf %22 : vector<8x32xf32>
    %24 = math.exp %23 : vector<8x32xf32>
    %cst_14 = arith.constant 1.000000e+00 : f32
    %25 = vector.broadcast %cst_14 : f32 to vector<8x32xf32>
    %26 = arith.addf %25, %24 : vector<8x32xf32>
    %27 = arith.divf %25, %26 : vector<8x32xf32>
    %28 = vector.extract_strided_slice %15 {offsets = [0, 64], sizes = [8, 32], strides = [1, 1]} : vector<8x128xf32> to vector<8x32xf32>
    %29 = math.tanh %28 : vector<8x32xf32>
    %30 = vector.extract_strided_slice %15 {offsets = [0, 96], sizes = [8, 32], strides = [1, 1]} : vector<8x128xf32> to vector<8x32xf32>
    %31 = arith.negf %30 : vector<8x32xf32>
    %32 = math.exp %31 : vector<8x32xf32>
    %cst_15 = arith.constant 1.000000e+00 : f32
    %33 = vector.broadcast %cst_15 : f32 to vector<8x32xf32>
    %34 = arith.addf %33, %32 : vector<8x32xf32>
    %35 = arith.divf %33, %34 : vector<8x32xf32>
    %36 = arith.mulf %27, %9 : vector<8x32xf32>
    %37 = arith.mulf %21, %29 : vector<8x32xf32>
    %38 = arith.addf %36, %37 : vector<8x32xf32>
    %39 = math.tanh %38 : vector<8x32xf32>
    %40 = arith.mulf %35, %39 : vector<8x32xf32>
    %41 = arith.index_cast %11 : i32 to index
    %c0_16 = arith.constant 0 : index
    %42 = vector.load %arg10[%41, %c0_16] : memref<64x32xf32, #tpu.memory_space<vmem>>, vector<8x32xf32>
    tpu.vector_store %arg10[%41, %c0_16], %40 {strides = array<i32>} : memref<64x32xf32, #tpu.memory_space<vmem>>, vector<8x32xf32>,
    %c1_i32 = arith.constant 1 : i32
    %c8_i32_17 = arith.constant 8 : i32
    %43 = arith.muli %c1_i32, %c8_i32_17 : i32
    %44 = tpu.assume_multiple %43, 8 : i32
    %45 = arith.index_cast %44 : i32 to index
    %c0_18 = arith.constant 0 : index
    %46 = vector.load %arg11[%45, %c0_18] : memref<64x128xf32, #tpu.memory_space<vmem>>, vector<8x128xf32>
    %cst_19 = arith.constant dense<0.000000e+00> : vector<8x128xf32>
    %47 = tpu.matmul %40, %1, %cst_19 {dimension_numbers = #tpu.dot_dimension_numbers<[1], [0], [0], [1], [0, 0, 1, 1], [], []>} : vector<8x32xf32>, vector<32x128xf32>, vector<8x128xf32> -> vector<8x128xf32>
    %48 = arith.addf %46, %47 : vector<8x128xf32>
    %49 = vector.extract_strided_slice %48 {offsets = [0, 0], sizes = [8, 32], strides = [1, 1]} : vector<8x128xf32> to vector<8x32xf32>
    %50 = arith.negf %49 : vector<8x32xf32>
    %51 = math.exp %50 : vector<8x32xf32>
    %cst_20 = arith.constant 1.000000e+00 : f32
    %52 = vector.broadcast %cst_20 : f32 to vector<8x32xf32>
    %53 = arith.addf %52, %51 : vector<8x32xf32>
    %54 = arith.divf %52, %53 : vector<8x32xf32>
    %55 = vector.extract_strided_slice %48 {offsets = [0, 32], sizes = [8, 32], strides = [1, 1]} : vector<8x128xf32> to vector<8x32xf32>
    %56 = arith.negf %55 : vector<8x32xf32>
    %57 = math.exp %56 : vector<8x32xf32>
    %cst_21 = arith.constant 1.000000e+00 : f32
    %58 = vector.broadcast %cst_21 : f32 to vector<8x32xf32>
    %59 = arith.addf %58, %57 : vector<8x32xf32>
    %60 = arith.divf %58, %59 : vector<8x32xf32>
    %61 = vector.extract_strided_slice %48 {offsets = [0, 64], sizes = [8, 32], strides = [1, 1]} : vector<8x128xf32> to vector<8x32xf32>
    %62 = math.tanh %61 : vector<8x32xf32>
    %63 = vector.extract_strided_slice %48 {offsets = [0, 96], sizes = [8, 32], strides = [1, 1]} : vector<8x128xf32> to vector<8x32xf32>
    %64 = arith.negf %63 : vector<8x32xf32>
    %65 = math.exp %64 : vector<8x32xf32>
    %cst_22 = arith.constant 1.000000e+00 : f32
    %66 = vector.broadcast %cst_22 : f32 to vector<8x32xf32>
    %67 = arith.addf %66, %65 : vector<8x32xf32>
    %68 = arith.divf %66, %67 : vector<8x32xf32>
    %69 = arith.mulf %60, %38 : vector<8x32xf32>
    %70 = arith.mulf %54, %62 : vector<8x32xf32>
    %71 = arith.addf %69, %70 : vector<8x32xf32>
    %72 = math.tanh %71 : vector<8x32xf32>
    %73 = arith.mulf %68, %72 : vector<8x32xf32>
    %74 = arith.index_cast %44 : i32 to index
    %c0_23 = arith.constant 0 : index
    %75 = vector.load %arg10[%74, %c0_23] : memref<64x32xf32, #tpu.memory_space<vmem>>, vector<8x32xf32>
    tpu.vector_store %arg10[%74, %c0_23], %73 {strides = array<i32>} : memref<64x32xf32, #tpu.memory_space<vmem>>, vector<8x32xf32>,
    %c2_i32 = arith.constant 2 : i32
    %c8_i32_24 = arith.constant 8 : i32
    %76 = arith.muli %c2_i32, %c8_i32_24 : i32
    %77 = tpu.assume_multiple %76, 8 : i32
    %78 = arith.index_cast %77 : i32 to index
    %c0_25 = arith.constant 0 : index
    %79 = vector.load %arg11[%78, %c0_25] : memref<64x128xf32, #tpu.memory_space<vmem>>, vector<8x128xf32>
    %cst_26 = arith.constant dense<0.000000e+00> : vector<8x128xf32>
    %80 = tpu.matmul %73, %1, %cst_26 {dimension_numbers = #tpu.dot_dimension_numbers<[1], [0], [0], [1], [0, 0, 1, 1], [], []>} : vector<8x32xf32>, vector<32x128xf32>, vector<8x128xf32> -> vector<8x128xf32>
    %81 = arith.addf %79, %80 : vector<8x128xf32>
    %82 = vector.extract_strided_slice %81 {offsets = [0, 0], sizes = [8, 32], strides = [1, 1]} : vector<8x128xf32> to vector<8x32xf32>
    %83 = arith.negf %82 : vector<8x32xf32>
    %84 = math.exp %83 : vector<8x32xf32>
    %cst_27 = arith.constant 1.000000e+00 : f32
    %85 = vector.broadcast %cst_27 : f32 to vector<8x32xf32>
    %86 = arith.addf %85, %84 : vector<8x32xf32>
    %87 = arith.divf %85, %86 : vector<8x32xf32>
    %88 = vector.extract_strided_slice %81 {offsets = [0, 32], sizes = [8, 32], strides = [1, 1]} : vector<8x128xf32> to vector<8x32xf32>
    %89 = arith.negf %88 : vector<8x32xf32>
    %90 = math.exp %89 : vector<8x32xf32>
    %cst_28 = arith.constant 1.000000e+00 : f32
    %91 = vector.broadcast %cst_28 : f32 to vector<8x32xf32>
    %92 = arith.addf %91, %90 : vector<8x32xf32>
    %93 = arith.divf %91, %92 : vector<8x32xf32>
    %94 = vector.extract_strided_slice %81 {offsets = [0, 64], sizes = [8, 32], strides = [1, 1]} : vector<8x128xf32> to vector<8x32xf32>
    %95 = math.tanh %94 : vector<8x32xf32>
    %96 = vector.extract_strided_slice %81 {offsets = [0, 96], sizes = [8, 32], strides = [1, 1]} : vector<8x128xf32> to vector<8x32xf32>
    %97 = arith.negf %96 : vector<8x32xf32>
    %98 = math.exp %97 : vector<8x32xf32>
    %cst_29 = arith.constant 1.000000e+00 : f32
    %99 = vector.broadcast %cst_29 : f32 to vector<8x32xf32>
    %100 = arith.addf %99, %98 : vector<8x32xf32>
    %101 = arith.divf %99, %100 : vector<8x32xf32>
    %102 = arith.mulf %93, %71 : vector<8x32xf32>
    %103 = arith.mulf %87, %95 : vector<8x32xf32>
    %104 = arith.addf %102, %103 : vector<8x32xf32>
    %105 = math.tanh %104 : vector<8x32xf32>
    %106 = arith.mulf %101, %105 : vector<8x32xf32>
    %107 = arith.index_cast %77 : i32 to index
    %c0_30 = arith.constant 0 : index
    %108 = vector.load %arg10[%107, %c0_30] : memref<64x32xf32, #tpu.memory_space<vmem>>, vector<8x32xf32>
    tpu.vector_store %arg10[%107, %c0_30], %106 {strides = array<i32>} : memref<64x32xf32, #tpu.memory_space<vmem>>, vector<8x32xf32>,
    %c3_i32 = arith.constant 3 : i32
    %c8_i32_31 = arith.constant 8 : i32
    %109 = arith.muli %c3_i32, %c8_i32_31 : i32
    %110 = tpu.assume_multiple %109, 8 : i32
    %111 = arith.index_cast %110 : i32 to index
    %c0_32 = arith.constant 0 : index
    %112 = vector.load %arg11[%111, %c0_32] : memref<64x128xf32, #tpu.memory_space<vmem>>, vector<8x128xf32>
    %cst_33 = arith.constant dense<0.000000e+00> : vector<8x128xf32>
    %113 = tpu.matmul %106, %1, %cst_33 {dimension_numbers = #tpu.dot_dimension_numbers<[1], [0], [0], [1], [0, 0, 1, 1], [], []>} : vector<8x32xf32>, vector<32x128xf32>, vector<8x128xf32> -> vector<8x128xf32>
    %114 = arith.addf %112, %113 : vector<8x128xf32>
    %115 = vector.extract_strided_slice %114 {offsets = [0, 0], sizes = [8, 32], strides = [1, 1]} : vector<8x128xf32> to vector<8x32xf32>
    %116 = arith.negf %115 : vector<8x32xf32>
    %117 = math.exp %116 : vector<8x32xf32>
    %cst_34 = arith.constant 1.000000e+00 : f32
    %118 = vector.broadcast %cst_34 : f32 to vector<8x32xf32>
    %119 = arith.addf %118, %117 : vector<8x32xf32>
    %120 = arith.divf %118, %119 : vector<8x32xf32>
    %121 = vector.extract_strided_slice %114 {offsets = [0, 32], sizes = [8, 32], strides = [1, 1]} : vector<8x128xf32> to vector<8x32xf32>
    %122 = arith.negf %121 : vector<8x32xf32>
    %123 = math.exp %122 : vector<8x32xf32>
    %cst_35 = arith.constant 1.000000e+00 : f32
    %124 = vector.broadcast %cst_35 : f32 to vector<8x32xf32>
    %125 = arith.addf %124, %123 : vector<8x32xf32>
    %126 = arith.divf %124, %125 : vector<8x32xf32>
    %127 = vector.extract_strided_slice %114 {offsets = [0, 64], sizes = [8, 32], strides = [1, 1]} : vector<8x128xf32> to vector<8x32xf32>
    %128 = math.tanh %127 : vector<8x32xf32>
    %129 = vector.extract_strided_slice %114 {offsets = [0, 96], sizes = [8, 32], strides = [1, 1]} : vector<8x128xf32> to vector<8x32xf32>
    %130 = arith.negf %129 : vector<8x32xf32>
    %131 = math.exp %130 : vector<8x32xf32>
    %cst_36 = arith.constant 1.000000e+00 : f32
    %132 = vector.broadcast %cst_36 : f32 to vector<8x32xf32>
    %133 = arith.addf %132, %131 : vector<8x32xf32>
    %134 = arith.divf %132, %133 : vector<8x32xf32>
    %135 = arith.mulf %126, %104 : vector<8x32xf32>
    %136 = arith.mulf %120, %128 : vector<8x32xf32>
    %137 = arith.addf %135, %136 : vector<8x32xf32>
    %138 = math.tanh %137 : vector<8x32xf32>
    %139 = arith.mulf %134, %138 : vector<8x32xf32>
    %140 = arith.index_cast %110 : i32 to index
    %c0_37 = arith.constant 0 : index
    %141 = vector.load %arg10[%140, %c0_37] : memref<64x32xf32, #tpu.memory_space<vmem>>, vector<8x32xf32>
    tpu.vector_store %arg10[%140, %c0_37], %139 {strides = array<i32>} : memref<64x32xf32, #tpu.memory_space<vmem>>, vector<8x32xf32>,
    %c4_i32 = arith.constant 4 : i32
    %c8_i32_38 = arith.constant 8 : i32
    %142 = arith.muli %c4_i32, %c8_i32_38 : i32
    %143 = tpu.assume_multiple %142, 8 : i32
    %144 = arith.index_cast %143 : i32 to index
    %c0_39 = arith.constant 0 : index
    %145 = vector.load %arg11[%144, %c0_39] : memref<64x128xf32, #tpu.memory_space<vmem>>, vector<8x128xf32>
    %cst_40 = arith.constant dense<0.000000e+00> : vector<8x128xf32>
    %146 = tpu.matmul %139, %1, %cst_40 {dimension_numbers = #tpu.dot_dimension_numbers<[1], [0], [0], [1], [0, 0, 1, 1], [], []>} : vector<8x32xf32>, vector<32x128xf32>, vector<8x128xf32> -> vector<8x128xf32>
    %147 = arith.addf %145, %146 : vector<8x128xf32>
    %148 = vector.extract_strided_slice %147 {offsets = [0, 0], sizes = [8, 32], strides = [1, 1]} : vector<8x128xf32> to vector<8x32xf32>
    %149 = arith.negf %148 : vector<8x32xf32>
    %150 = math.exp %149 : vector<8x32xf32>
    %cst_41 = arith.constant 1.000000e+00 : f32
    %151 = vector.broadcast %cst_41 : f32 to vector<8x32xf32>
    %152 = arith.addf %151, %150 : vector<8x32xf32>
    %153 = arith.divf %151, %152 : vector<8x32xf32>
    %154 = vector.extract_strided_slice %147 {offsets = [0, 32], sizes = [8, 32], strides = [1, 1]} : vector<8x128xf32> to vector<8x32xf32>
    %155 = arith.negf %154 : vector<8x32xf32>
    %156 = math.exp %155 : vector<8x32xf32>
    %cst_42 = arith.constant 1.000000e+00 : f32
    %157 = vector.broadcast %cst_42 : f32 to vector<8x32xf32>
    %158 = arith.addf %157, %156 : vector<8x32xf32>
    %159 = arith.divf %157, %158 : vector<8x32xf32>
    %160 = vector.extract_strided_slice %147 {offsets = [0, 64], sizes = [8, 32], strides = [1, 1]} : vector<8x128xf32> to vector<8x32xf32>
    %161 = math.tanh %160 : vector<8x32xf32>
    %162 = vector.extract_strided_slice %147 {offsets = [0, 96], sizes = [8, 32], strides = [1, 1]} : vector<8x128xf32> to vector<8x32xf32>
    %163 = arith.negf %162 : vector<8x32xf32>
    %164 = math.exp %163 : vector<8x32xf32>
    %cst_43 = arith.constant 1.000000e+00 : f32
    %165 = vector.broadcast %cst_43 : f32 to vector<8x32xf32>
    %166 = arith.addf %165, %164 : vector<8x32xf32>
    %167 = arith.divf %165, %166 : vector<8x32xf32>
    %168 = arith.mulf %159, %137 : vector<8x32xf32>
    %169 = arith.mulf %153, %161 : vector<8x32xf32>
    %170 = arith.addf %168, %169 : vector<8x32xf32>
    %171 = math.tanh %170 : vector<8x32xf32>
    %172 = arith.mulf %167, %171 : vector<8x32xf32>
    %173 = arith.index_cast %143 : i32 to index
    %c0_44 = arith.constant 0 : index
    %174 = vector.load %arg10[%173, %c0_44] : memref<64x32xf32, #tpu.memory_space<vmem>>, vector<8x32xf32>
    tpu.vector_store %arg10[%173, %c0_44], %172 {strides = array<i32>} : memref<64x32xf32, #tpu.memory_space<vmem>>, vector<8x32xf32>,
    %c5_i32 = arith.constant 5 : i32
    %c8_i32_45 = arith.constant 8 : i32
    %175 = arith.muli %c5_i32, %c8_i32_45 : i32
    %176 = tpu.assume_multiple %175, 8 : i32
    %177 = arith.index_cast %176 : i32 to index
    %c0_46 = arith.constant 0 : index
    %178 = vector.load %arg11[%177, %c0_46] : memref<64x128xf32, #tpu.memory_space<vmem>>, vector<8x128xf32>
    %cst_47 = arith.constant dense<0.000000e+00> : vector<8x128xf32>
    %179 = tpu.matmul %172, %1, %cst_47 {dimension_numbers = #tpu.dot_dimension_numbers<[1], [0], [0], [1], [0, 0, 1, 1], [], []>} : vector<8x32xf32>, vector<32x128xf32>, vector<8x128xf32> -> vector<8x128xf32>
    %180 = arith.addf %178, %179 : vector<8x128xf32>
    %181 = vector.extract_strided_slice %180 {offsets = [0, 0], sizes = [8, 32], strides = [1, 1]} : vector<8x128xf32> to vector<8x32xf32>
    %182 = arith.negf %181 : vector<8x32xf32>
    %183 = math.exp %182 : vector<8x32xf32>
    %cst_48 = arith.constant 1.000000e+00 : f32
    %184 = vector.broadcast %cst_48 : f32 to vector<8x32xf32>
    %185 = arith.addf %184, %183 : vector<8x32xf32>
    %186 = arith.divf %184, %185 : vector<8x32xf32>
    %187 = vector.extract_strided_slice %180 {offsets = [0, 32], sizes = [8, 32], strides = [1, 1]} : vector<8x128xf32> to vector<8x32xf32>
    %188 = arith.negf %187 : vector<8x32xf32>
    %189 = math.exp %188 : vector<8x32xf32>
    %cst_49 = arith.constant 1.000000e+00 : f32
    %190 = vector.broadcast %cst_49 : f32 to vector<8x32xf32>
    %191 = arith.addf %190, %189 : vector<8x32xf32>
    %192 = arith.divf %190, %191 : vector<8x32xf32>
    %193 = vector.extract_strided_slice %180 {offsets = [0, 64], sizes = [8, 32], strides = [1, 1]} : vector<8x128xf32> to vector<8x32xf32>
    %194 = math.tanh %193 : vector<8x32xf32>
    %195 = vector.extract_strided_slice %180 {offsets = [0, 96], sizes = [8, 32], strides = [1, 1]} : vector<8x128xf32> to vector<8x32xf32>
    %196 = arith.negf %195 : vector<8x32xf32>
    %197 = math.exp %196 : vector<8x32xf32>
    %cst_50 = arith.constant 1.000000e+00 : f32
    %198 = vector.broadcast %cst_50 : f32 to vector<8x32xf32>
    %199 = arith.addf %198, %197 : vector<8x32xf32>
    %200 = arith.divf %198, %199 : vector<8x32xf32>
    %201 = arith.mulf %192, %170 : vector<8x32xf32>
    %202 = arith.mulf %186, %194 : vector<8x32xf32>
    %203 = arith.addf %201, %202 : vector<8x32xf32>
    %204 = math.tanh %203 : vector<8x32xf32>
    %205 = arith.mulf %200, %204 : vector<8x32xf32>
    %206 = arith.index_cast %176 : i32 to index
    %c0_51 = arith.constant 0 : index
    %207 = vector.load %arg10[%206, %c0_51] : memref<64x32xf32, #tpu.memory_space<vmem>>, vector<8x32xf32>
    tpu.vector_store %arg10[%206, %c0_51], %205 {strides = array<i32>} : memref<64x32xf32, #tpu.memory_space<vmem>>, vector<8x32xf32>,
    %c6_i32 = arith.constant 6 : i32
    %c8_i32_52 = arith.constant 8 : i32
    %208 = arith.muli %c6_i32, %c8_i32_52 : i32
    %209 = tpu.assume_multiple %208, 8 : i32
    %210 = arith.index_cast %209 : i32 to index
    %c0_53 = arith.constant 0 : index
    %211 = vector.load %arg11[%210, %c0_53] : memref<64x128xf32, #tpu.memory_space<vmem>>, vector<8x128xf32>
    %cst_54 = arith.constant dense<0.000000e+00> : vector<8x128xf32>
    %212 = tpu.matmul %205, %1, %cst_54 {dimension_numbers = #tpu.dot_dimension_numbers<[1], [0], [0], [1], [0, 0, 1, 1], [], []>} : vector<8x32xf32>, vector<32x128xf32>, vector<8x128xf32> -> vector<8x128xf32>
    %213 = arith.addf %211, %212 : vector<8x128xf32>
    %214 = vector.extract_strided_slice %213 {offsets = [0, 0], sizes = [8, 32], strides = [1, 1]} : vector<8x128xf32> to vector<8x32xf32>
    %215 = arith.negf %214 : vector<8x32xf32>
    %216 = math.exp %215 : vector<8x32xf32>
    %cst_55 = arith.constant 1.000000e+00 : f32
    %217 = vector.broadcast %cst_55 : f32 to vector<8x32xf32>
    %218 = arith.addf %217, %216 : vector<8x32xf32>
    %219 = arith.divf %217, %218 : vector<8x32xf32>
    %220 = vector.extract_strided_slice %213 {offsets = [0, 32], sizes = [8, 32], strides = [1, 1]} : vector<8x128xf32> to vector<8x32xf32>
    %221 = arith.negf %220 : vector<8x32xf32>
    %222 = math.exp %221 : vector<8x32xf32>
    %cst_56 = arith.constant 1.000000e+00 : f32
    %223 = vector.broadcast %cst_56 : f32 to vector<8x32xf32>
    %224 = arith.addf %223, %222 : vector<8x32xf32>
    %225 = arith.divf %223, %224 : vector<8x32xf32>
    %226 = vector.extract_strided_slice %213 {offsets = [0, 64], sizes = [8, 32], strides = [1, 1]} : vector<8x128xf32> to vector<8x32xf32>
    %227 = math.tanh %226 : vector<8x32xf32>
    %228 = vector.extract_strided_slice %213 {offsets = [0, 96], sizes = [8, 32], strides = [1, 1]} : vector<8x128xf32> to vector<8x32xf32>
    %229 = arith.negf %228 : vector<8x32xf32>
    %230 = math.exp %229 : vector<8x32xf32>
    %cst_57 = arith.constant 1.000000e+00 : f32
    %231 = vector.broadcast %cst_57 : f32 to vector<8x32xf32>
    %232 = arith.addf %231, %230 : vector<8x32xf32>
    %233 = arith.divf %231, %232 : vector<8x32xf32>
    %234 = arith.mulf %225, %203 : vector<8x32xf32>
    %235 = arith.mulf %219, %227 : vector<8x32xf32>
    %236 = arith.addf %234, %235 : vector<8x32xf32>
    %237 = math.tanh %236 : vector<8x32xf32>
    %238 = arith.mulf %233, %237 : vector<8x32xf32>
    %239 = arith.index_cast %209 : i32 to index
    %c0_58 = arith.constant 0 : index
    %240 = vector.load %arg10[%239, %c0_58] : memref<64x32xf32, #tpu.memory_space<vmem>>, vector<8x32xf32>
    tpu.vector_store %arg10[%239, %c0_58], %238 {strides = array<i32>} : memref<64x32xf32, #tpu.memory_space<vmem>>, vector<8x32xf32>,
    %c7_i32 = arith.constant 7 : i32
    %c8_i32_59 = arith.constant 8 : i32
    %241 = arith.muli %c7_i32, %c8_i32_59 : i32
    %242 = tpu.assume_multiple %241, 8 : i32
    %243 = arith.index_cast %242 : i32 to index
    %c0_60 = arith.constant 0 : index
    %244 = vector.load %arg11[%243, %c0_60] : memref<64x128xf32, #tpu.memory_space<vmem>>, vector<8x128xf32>
    %cst_61 = arith.constant dense<0.000000e+00> : vector<8x128xf32>
    %245 = tpu.matmul %238, %1, %cst_61 {dimension_numbers = #tpu.dot_dimension_numbers<[1], [0], [0], [1], [0, 0, 1, 1], [], []>} : vector<8x32xf32>, vector<32x128xf32>, vector<8x128xf32> -> vector<8x128xf32>
    %246 = arith.addf %244, %245 : vector<8x128xf32>
    %247 = vector.extract_strided_slice %246 {offsets = [0, 0], sizes = [8, 32], strides = [1, 1]} : vector<8x128xf32> to vector<8x32xf32>
    %248 = arith.negf %247 : vector<8x32xf32>
    %249 = math.exp %248 : vector<8x32xf32>
    %cst_62 = arith.constant 1.000000e+00 : f32
    %250 = vector.broadcast %cst_62 : f32 to vector<8x32xf32>
    %251 = arith.addf %250, %249 : vector<8x32xf32>
    %252 = arith.divf %250, %251 : vector<8x32xf32>
    %253 = vector.extract_strided_slice %246 {offsets = [0, 32], sizes = [8, 32], strides = [1, 1]} : vector<8x128xf32> to vector<8x32xf32>
    %254 = arith.negf %253 : vector<8x32xf32>
    %255 = math.exp %254 : vector<8x32xf32>
    %cst_63 = arith.constant 1.000000e+00 : f32
    %256 = vector.broadcast %cst_63 : f32 to vector<8x32xf32>
    %257 = arith.addf %256, %255 : vector<8x32xf32>
    %258 = arith.divf %256, %257 : vector<8x32xf32>
    %259 = vector.extract_strided_slice %246 {offsets = [0, 64], sizes = [8, 32], strides = [1, 1]} : vector<8x128xf32> to vector<8x32xf32>
    %260 = math.tanh %259 : vector<8x32xf32>
    %261 = vector.extract_strided_slice %246 {offsets = [0, 96], sizes = [8, 32], strides = [1, 1]} : vector<8x128xf32> to vector<8x32xf32>
    %262 = arith.negf %261 : vector<8x32xf32>
    %263 = math.exp %262 : vector<8x32xf32>
    %cst_64 = arith.constant 1.000000e+00 : f32
    %264 = vector.broadcast %cst_64 : f32 to vector<8x32xf32>
    %265 = arith.addf %264, %263 : vector<8x32xf32>
    %266 = arith.divf %264, %265 : vector<8x32xf32>
    %267 = arith.mulf %258, %236 : vector<8x32xf32>
    %268 = arith.mulf %252, %260 : vector<8x32xf32>
    %269 = arith.addf %267, %268 : vector<8x32xf32>
    %270 = math.tanh %269 : vector<8x32xf32>
    %271 = arith.mulf %266, %270 : vector<8x32xf32>
    %272 = arith.index_cast %242 : i32 to index
    %c0_65 = arith.constant 0 : index
    %273 = vector.load %arg10[%272, %c0_65] : memref<64x32xf32, #tpu.memory_space<vmem>>, vector<8x32xf32>
    tpu.vector_store %arg10[%272, %c0_65], %271 {strides = array<i32>} : memref<64x32xf32, #tpu.memory_space<vmem>>, vector<8x32xf32>,
    %c8_i32_66 = arith.constant 8 : i32
    %c0_67 = arith.constant 0 : index
    %c0_68 = arith.constant 0 : index
    %274 = vector.load %arg4[%c0_67, %c0_68] : memref<32x128xf32, #tpu.memory_space<vmem>>, vector<32x128xf32>
    %c0_69 = arith.constant 0 : index
    %c0_70 = arith.constant 0 : index
    %275 = vector.load %arg5[%c0_69, %c0_70] : memref<32x128xf32, #tpu.memory_space<vmem>>, vector<32x128xf32>
    %c0_71 = arith.constant 0 : index
    %c0_72 = arith.constant 0 : index
    %276 = vector.load %arg6[%c0_71, %c0_72] : memref<1x128xf32, #tpu.memory_space<vmem>>, vector<1x128xf32>
    %c0_73 = arith.constant 0 : index
    %c0_74 = arith.constant 0 : index
    %277 = vector.load %arg10[%c0_73, %c0_74] : memref<64x32xf32, #tpu.memory_space<vmem>>, vector<64x32xf32>
    %cst_75 = arith.constant dense<0.000000e+00> : vector<64x128xf32>
    %278 = tpu.matmul %277, %274, %cst_75 {dimension_numbers = #tpu.dot_dimension_numbers<[1], [0], [0], [1], [0, 0, 1, 1], [], []>} : vector<64x32xf32>, vector<32x128xf32>, vector<64x128xf32> -> vector<64x128xf32>
    %279 = vector.broadcast %276 : vector<1x128xf32> to vector<64x128xf32>
    %280 = arith.addf %278, %279 : vector<64x128xf32>
    %c0_76 = arith.constant 0 : index
    %c0_77 = arith.constant 0 : index
    %281 = vector.load %arg11[%c0_76, %c0_77] : memref<64x128xf32, #tpu.memory_space<vmem>>, vector<64x128xf32>
    tpu.vector_store %arg11[%c0_76, %c0_77], %280 {strides = array<i32>} : memref<64x128xf32, #tpu.memory_space<vmem>>, vector<64x128xf32>,
    %cst_78 = arith.constant 0.000000e+00 : f32
    %282 = vector.broadcast %cst_78 : f32 to vector<8x32xf32>
    %cst_79 = arith.constant 0.000000e+00 : f32
    %283 = vector.broadcast %cst_79 : f32 to vector<8x32xf32>
    %c0_i32_80 = arith.constant 0 : i32
    %c8_i32_81 = arith.constant 8 : i32
    %284 = arith.muli %c0_i32_80, %c8_i32_81 : i32
    %285 = tpu.assume_multiple %284, 8 : i32
    %286 = arith.index_cast %285 : i32 to index
    %c0_82 = arith.constant 0 : index
    %287 = vector.load %arg11[%286, %c0_82] : memref<64x128xf32, #tpu.memory_space<vmem>>, vector<8x128xf32>
    %cst_83 = arith.constant dense<0.000000e+00> : vector<8x128xf32>
    %288 = tpu.matmul %282, %275, %cst_83 {dimension_numbers = #tpu.dot_dimension_numbers<[1], [0], [0], [1], [0, 0, 1, 1], [], []>} : vector<8x32xf32>, vector<32x128xf32>, vector<8x128xf32> -> vector<8x128xf32>
    %289 = arith.addf %287, %288 : vector<8x128xf32>
    %290 = vector.extract_strided_slice %289 {offsets = [0, 0], sizes = [8, 32], strides = [1, 1]} : vector<8x128xf32> to vector<8x32xf32>
    %291 = arith.negf %290 : vector<8x32xf32>
    %292 = math.exp %291 : vector<8x32xf32>
    %cst_84 = arith.constant 1.000000e+00 : f32
    %293 = vector.broadcast %cst_84 : f32 to vector<8x32xf32>
    %294 = arith.addf %293, %292 : vector<8x32xf32>
    %295 = arith.divf %293, %294 : vector<8x32xf32>
    %296 = vector.extract_strided_slice %289 {offsets = [0, 32], sizes = [8, 32], strides = [1, 1]} : vector<8x128xf32> to vector<8x32xf32>
    %297 = arith.negf %296 : vector<8x32xf32>
    %298 = math.exp %297 : vector<8x32xf32>
    %cst_85 = arith.constant 1.000000e+00 : f32
    %299 = vector.broadcast %cst_85 : f32 to vector<8x32xf32>
    %300 = arith.addf %299, %298 : vector<8x32xf32>
    %301 = arith.divf %299, %300 : vector<8x32xf32>
    %302 = vector.extract_strided_slice %289 {offsets = [0, 64], sizes = [8, 32], strides = [1, 1]} : vector<8x128xf32> to vector<8x32xf32>
    %303 = math.tanh %302 : vector<8x32xf32>
    %304 = vector.extract_strided_slice %289 {offsets = [0, 96], sizes = [8, 32], strides = [1, 1]} : vector<8x128xf32> to vector<8x32xf32>
    %305 = arith.negf %304 : vector<8x32xf32>
    %306 = math.exp %305 : vector<8x32xf32>
    %cst_86 = arith.constant 1.000000e+00 : f32
    %307 = vector.broadcast %cst_86 : f32 to vector<8x32xf32>
    %308 = arith.addf %307, %306 : vector<8x32xf32>
    %309 = arith.divf %307, %308 : vector<8x32xf32>
    %310 = arith.mulf %301, %283 : vector<8x32xf32>
    %311 = arith.mulf %295, %303 : vector<8x32xf32>
    %312 = arith.addf %310, %311 : vector<8x32xf32>
    %313 = math.tanh %312 : vector<8x32xf32>
    %314 = arith.mulf %309, %313 : vector<8x32xf32>
    %c1_i32_87 = arith.constant 1 : i32
    %c8_i32_88 = arith.constant 8 : i32
    %315 = arith.muli %c1_i32_87, %c8_i32_88 : i32
    %316 = tpu.assume_multiple %315, 8 : i32
    %317 = arith.index_cast %316 : i32 to index
    %c0_89 = arith.constant 0 : index
    %318 = vector.load %arg11[%317, %c0_89] : memref<64x128xf32, #tpu.memory_space<vmem>>, vector<8x128xf32>
    %cst_90 = arith.constant dense<0.000000e+00> : vector<8x128xf32>
    %319 = tpu.matmul %314, %275, %cst_90 {dimension_numbers = #tpu.dot_dimension_numbers<[1], [0], [0], [1], [0, 0, 1, 1], [], []>} : vector<8x32xf32>, vector<32x128xf32>, vector<8x128xf32> -> vector<8x128xf32>
    %320 = arith.addf %318, %319 : vector<8x128xf32>
    %321 = vector.extract_strided_slice %320 {offsets = [0, 0], sizes = [8, 32], strides = [1, 1]} : vector<8x128xf32> to vector<8x32xf32>
    %322 = arith.negf %321 : vector<8x32xf32>
    %323 = math.exp %322 : vector<8x32xf32>
    %cst_91 = arith.constant 1.000000e+00 : f32
    %324 = vector.broadcast %cst_91 : f32 to vector<8x32xf32>
    %325 = arith.addf %324, %323 : vector<8x32xf32>
    %326 = arith.divf %324, %325 : vector<8x32xf32>
    %327 = vector.extract_strided_slice %320 {offsets = [0, 32], sizes = [8, 32], strides = [1, 1]} : vector<8x128xf32> to vector<8x32xf32>
    %328 = arith.negf %327 : vector<8x32xf32>
    %329 = math.exp %328 : vector<8x32xf32>
    %cst_92 = arith.constant 1.000000e+00 : f32
    %330 = vector.broadcast %cst_92 : f32 to vector<8x32xf32>
    %331 = arith.addf %330, %329 : vector<8x32xf32>
    %332 = arith.divf %330, %331 : vector<8x32xf32>
    %333 = vector.extract_strided_slice %320 {offsets = [0, 64], sizes = [8, 32], strides = [1, 1]} : vector<8x128xf32> to vector<8x32xf32>
    %334 = math.tanh %333 : vector<8x32xf32>
    %335 = vector.extract_strided_slice %320 {offsets = [0, 96], sizes = [8, 32], strides = [1, 1]} : vector<8x128xf32> to vector<8x32xf32>
    %336 = arith.negf %335 : vector<8x32xf32>
    %337 = math.exp %336 : vector<8x32xf32>
    %cst_93 = arith.constant 1.000000e+00 : f32
    %338 = vector.broadcast %cst_93 : f32 to vector<8x32xf32>
    %339 = arith.addf %338, %337 : vector<8x32xf32>
    %340 = arith.divf %338, %339 : vector<8x32xf32>
    %341 = arith.mulf %332, %312 : vector<8x32xf32>
    %342 = arith.mulf %326, %334 : vector<8x32xf32>
    %343 = arith.addf %341, %342 : vector<8x32xf32>
    %344 = math.tanh %343 : vector<8x32xf32>
    %345 = arith.mulf %340, %344 : vector<8x32xf32>
    %c2_i32_94 = arith.constant 2 : i32
    %c8_i32_95 = arith.constant 8 : i32
    %346 = arith.muli %c2_i32_94, %c8_i32_95 : i32
    %347 = tpu.assume_multiple %346, 8 : i32
    %348 = arith.index_cast %347 : i32 to index
    %c0_96 = arith.constant 0 : index
    %349 = vector.load %arg11[%348, %c0_96] : memref<64x128xf32, #tpu.memory_space<vmem>>, vector<8x128xf32>
    %cst_97 = arith.constant dense<0.000000e+00> : vector<8x128xf32>
    %350 = tpu.matmul %345, %275, %cst_97 {dimension_numbers = #tpu.dot_dimension_numbers<[1], [0], [0], [1], [0, 0, 1, 1], [], []>} : vector<8x32xf32>, vector<32x128xf32>, vector<8x128xf32> -> vector<8x128xf32>
    %351 = arith.addf %349, %350 : vector<8x128xf32>
    %352 = vector.extract_strided_slice %351 {offsets = [0, 0], sizes = [8, 32], strides = [1, 1]} : vector<8x128xf32> to vector<8x32xf32>
    %353 = arith.negf %352 : vector<8x32xf32>
    %354 = math.exp %353 : vector<8x32xf32>
    %cst_98 = arith.constant 1.000000e+00 : f32
    %355 = vector.broadcast %cst_98 : f32 to vector<8x32xf32>
    %356 = arith.addf %355, %354 : vector<8x32xf32>
    %357 = arith.divf %355, %356 : vector<8x32xf32>
    %358 = vector.extract_strided_slice %351 {offsets = [0, 32], sizes = [8, 32], strides = [1, 1]} : vector<8x128xf32> to vector<8x32xf32>
    %359 = arith.negf %358 : vector<8x32xf32>
    %360 = math.exp %359 : vector<8x32xf32>
    %cst_99 = arith.constant 1.000000e+00 : f32
    %361 = vector.broadcast %cst_99 : f32 to vector<8x32xf32>
    %362 = arith.addf %361, %360 : vector<8x32xf32>
    %363 = arith.divf %361, %362 : vector<8x32xf32>
    %364 = vector.extract_strided_slice %351 {offsets = [0, 64], sizes = [8, 32], strides = [1, 1]} : vector<8x128xf32> to vector<8x32xf32>
    %365 = math.tanh %364 : vector<8x32xf32>
    %366 = vector.extract_strided_slice %351 {offsets = [0, 96], sizes = [8, 32], strides = [1, 1]} : vector<8x128xf32> to vector<8x32xf32>
    %367 = arith.negf %366 : vector<8x32xf32>
    %368 = math.exp %367 : vector<8x32xf32>
    %cst_100 = arith.constant 1.000000e+00 : f32
    %369 = vector.broadcast %cst_100 : f32 to vector<8x32xf32>
    %370 = arith.addf %369, %368 : vector<8x32xf32>
    %371 = arith.divf %369, %370 : vector<8x32xf32>
    %372 = arith.mulf %363, %343 : vector<8x32xf32>
    %373 = arith.mulf %357, %365 : vector<8x32xf32>
    %374 = arith.addf %372, %373 : vector<8x32xf32>
    %375 = math.tanh %374 : vector<8x32xf32>
    %376 = arith.mulf %371, %375 : vector<8x32xf32>
    %c3_i32_101 = arith.constant 3 : i32
    %c8_i32_102 = arith.constant 8 : i32
    %377 = arith.muli %c3_i32_101, %c8_i32_102 : i32
    %378 = tpu.assume_multiple %377, 8 : i32
    %379 = arith.index_cast %378 : i32 to index
    %c0_103 = arith.constant 0 : index
    %380 = vector.load %arg11[%379, %c0_103] : memref<64x128xf32, #tpu.memory_space<vmem>>, vector<8x128xf32>
    %cst_104 = arith.constant dense<0.000000e+00> : vector<8x128xf32>
    %381 = tpu.matmul %376, %275, %cst_104 {dimension_numbers = #tpu.dot_dimension_numbers<[1], [0], [0], [1], [0, 0, 1, 1], [], []>} : vector<8x32xf32>, vector<32x128xf32>, vector<8x128xf32> -> vector<8x128xf32>
    %382 = arith.addf %380, %381 : vector<8x128xf32>
    %383 = vector.extract_strided_slice %382 {offsets = [0, 0], sizes = [8, 32], strides = [1, 1]} : vector<8x128xf32> to vector<8x32xf32>
    %384 = arith.negf %383 : vector<8x32xf32>
    %385 = math.exp %384 : vector<8x32xf32>
    %cst_105 = arith.constant 1.000000e+00 : f32
    %386 = vector.broadcast %cst_105 : f32 to vector<8x32xf32>
    %387 = arith.addf %386, %385 : vector<8x32xf32>
    %388 = arith.divf %386, %387 : vector<8x32xf32>
    %389 = vector.extract_strided_slice %382 {offsets = [0, 32], sizes = [8, 32], strides = [1, 1]} : vector<8x128xf32> to vector<8x32xf32>
    %390 = arith.negf %389 : vector<8x32xf32>
    %391 = math.exp %390 : vector<8x32xf32>
    %cst_106 = arith.constant 1.000000e+00 : f32
    %392 = vector.broadcast %cst_106 : f32 to vector<8x32xf32>
    %393 = arith.addf %392, %391 : vector<8x32xf32>
    %394 = arith.divf %392, %393 : vector<8x32xf32>
    %395 = vector.extract_strided_slice %382 {offsets = [0, 64], sizes = [8, 32], strides = [1, 1]} : vector<8x128xf32> to vector<8x32xf32>
    %396 = math.tanh %395 : vector<8x32xf32>
    %397 = vector.extract_strided_slice %382 {offsets = [0, 96], sizes = [8, 32], strides = [1, 1]} : vector<8x128xf32> to vector<8x32xf32>
    %398 = arith.negf %397 : vector<8x32xf32>
    %399 = math.exp %398 : vector<8x32xf32>
    %cst_107 = arith.constant 1.000000e+00 : f32
    %400 = vector.broadcast %cst_107 : f32 to vector<8x32xf32>
    %401 = arith.addf %400, %399 : vector<8x32xf32>
    %402 = arith.divf %400, %401 : vector<8x32xf32>
    %403 = arith.mulf %394, %374 : vector<8x32xf32>
    %404 = arith.mulf %388, %396 : vector<8x32xf32>
    %405 = arith.addf %403, %404 : vector<8x32xf32>
    %406 = math.tanh %405 : vector<8x32xf32>
    %407 = arith.mulf %402, %406 : vector<8x32xf32>
    %c4_i32_108 = arith.constant 4 : i32
    %c8_i32_109 = arith.constant 8 : i32
    %408 = arith.muli %c4_i32_108, %c8_i32_109 : i32
    %409 = tpu.assume_multiple %408, 8 : i32
    %410 = arith.index_cast %409 : i32 to index
    %c0_110 = arith.constant 0 : index
    %411 = vector.load %arg11[%410, %c0_110] : memref<64x128xf32, #tpu.memory_space<vmem>>, vector<8x128xf32>
    %cst_111 = arith.constant dense<0.000000e+00> : vector<8x128xf32>
    %412 = tpu.matmul %407, %275, %cst_111 {dimension_numbers = #tpu.dot_dimension_numbers<[1], [0], [0], [1], [0, 0, 1, 1], [], []>} : vector<8x32xf32>, vector<32x128xf32>, vector<8x128xf32> -> vector<8x128xf32>
    %413 = arith.addf %411, %412 : vector<8x128xf32>
    %414 = vector.extract_strided_slice %413 {offsets = [0, 0], sizes = [8, 32], strides = [1, 1]} : vector<8x128xf32> to vector<8x32xf32>
    %415 = arith.negf %414 : vector<8x32xf32>
    %416 = math.exp %415 : vector<8x32xf32>
    %cst_112 = arith.constant 1.000000e+00 : f32
    %417 = vector.broadcast %cst_112 : f32 to vector<8x32xf32>
    %418 = arith.addf %417, %416 : vector<8x32xf32>
    %419 = arith.divf %417, %418 : vector<8x32xf32>
    %420 = vector.extract_strided_slice %413 {offsets = [0, 32], sizes = [8, 32], strides = [1, 1]} : vector<8x128xf32> to vector<8x32xf32>
    %421 = arith.negf %420 : vector<8x32xf32>
    %422 = math.exp %421 : vector<8x32xf32>
    %cst_113 = arith.constant 1.000000e+00 : f32
    %423 = vector.broadcast %cst_113 : f32 to vector<8x32xf32>
    %424 = arith.addf %423, %422 : vector<8x32xf32>
    %425 = arith.divf %423, %424 : vector<8x32xf32>
    %426 = vector.extract_strided_slice %413 {offsets = [0, 64], sizes = [8, 32], strides = [1, 1]} : vector<8x128xf32> to vector<8x32xf32>
    %427 = math.tanh %426 : vector<8x32xf32>
    %428 = vector.extract_strided_slice %413 {offsets = [0, 96], sizes = [8, 32], strides = [1, 1]} : vector<8x128xf32> to vector<8x32xf32>
    %429 = arith.negf %428 : vector<8x32xf32>
    %430 = math.exp %429 : vector<8x32xf32>
    %cst_114 = arith.constant 1.000000e+00 : f32
    %431 = vector.broadcast %cst_114 : f32 to vector<8x32xf32>
    %432 = arith.addf %431, %430 : vector<8x32xf32>
    %433 = arith.divf %431, %432 : vector<8x32xf32>
    %434 = arith.mulf %425, %405 : vector<8x32xf32>
    %435 = arith.mulf %419, %427 : vector<8x32xf32>
    %436 = arith.addf %434, %435 : vector<8x32xf32>
    %437 = math.tanh %436 : vector<8x32xf32>
    %438 = arith.mulf %433, %437 : vector<8x32xf32>
    %c5_i32_115 = arith.constant 5 : i32
    %c8_i32_116 = arith.constant 8 : i32
    %439 = arith.muli %c5_i32_115, %c8_i32_116 : i32
    %440 = tpu.assume_multiple %439, 8 : i32
    %441 = arith.index_cast %440 : i32 to index
    %c0_117 = arith.constant 0 : index
    %442 = vector.load %arg11[%441, %c0_117] : memref<64x128xf32, #tpu.memory_space<vmem>>, vector<8x128xf32>
    %cst_118 = arith.constant dense<0.000000e+00> : vector<8x128xf32>
    %443 = tpu.matmul %438, %275, %cst_118 {dimension_numbers = #tpu.dot_dimension_numbers<[1], [0], [0], [1], [0, 0, 1, 1], [], []>} : vector<8x32xf32>, vector<32x128xf32>, vector<8x128xf32> -> vector<8x128xf32>
    %444 = arith.addf %442, %443 : vector<8x128xf32>
    %445 = vector.extract_strided_slice %444 {offsets = [0, 0], sizes = [8, 32], strides = [1, 1]} : vector<8x128xf32> to vector<8x32xf32>
    %446 = arith.negf %445 : vector<8x32xf32>
    %447 = math.exp %446 : vector<8x32xf32>
    %cst_119 = arith.constant 1.000000e+00 : f32
    %448 = vector.broadcast %cst_119 : f32 to vector<8x32xf32>
    %449 = arith.addf %448, %447 : vector<8x32xf32>
    %450 = arith.divf %448, %449 : vector<8x32xf32>
    %451 = vector.extract_strided_slice %444 {offsets = [0, 32], sizes = [8, 32], strides = [1, 1]} : vector<8x128xf32> to vector<8x32xf32>
    %452 = arith.negf %451 : vector<8x32xf32>
    %453 = math.exp %452 : vector<8x32xf32>
    %cst_120 = arith.constant 1.000000e+00 : f32
    %454 = vector.broadcast %cst_120 : f32 to vector<8x32xf32>
    %455 = arith.addf %454, %453 : vector<8x32xf32>
    %456 = arith.divf %454, %455 : vector<8x32xf32>
    %457 = vector.extract_strided_slice %444 {offsets = [0, 64], sizes = [8, 32], strides = [1, 1]} : vector<8x128xf32> to vector<8x32xf32>
    %458 = math.tanh %457 : vector<8x32xf32>
    %459 = vector.extract_strided_slice %444 {offsets = [0, 96], sizes = [8, 32], strides = [1, 1]} : vector<8x128xf32> to vector<8x32xf32>
    %460 = arith.negf %459 : vector<8x32xf32>
    %461 = math.exp %460 : vector<8x32xf32>
    %cst_121 = arith.constant 1.000000e+00 : f32
    %462 = vector.broadcast %cst_121 : f32 to vector<8x32xf32>
    %463 = arith.addf %462, %461 : vector<8x32xf32>
    %464 = arith.divf %462, %463 : vector<8x32xf32>
    %465 = arith.mulf %456, %436 : vector<8x32xf32>
    %466 = arith.mulf %450, %458 : vector<8x32xf32>
    %467 = arith.addf %465, %466 : vector<8x32xf32>
    %468 = math.tanh %467 : vector<8x32xf32>
    %469 = arith.mulf %464, %468 : vector<8x32xf32>
    %c6_i32_122 = arith.constant 6 : i32
    %c8_i32_123 = arith.constant 8 : i32
    %470 = arith.muli %c6_i32_122, %c8_i32_123 : i32
    %471 = tpu.assume_multiple %470, 8 : i32
    %472 = arith.index_cast %471 : i32 to index
    %c0_124 = arith.constant 0 : index
    %473 = vector.load %arg11[%472, %c0_124] : memref<64x128xf32, #tpu.memory_space<vmem>>, vector<8x128xf32>
    %cst_125 = arith.constant dense<0.000000e+00> : vector<8x128xf32>
    %474 = tpu.matmul %469, %275, %cst_125 {dimension_numbers = #tpu.dot_dimension_numbers<[1], [0], [0], [1], [0, 0, 1, 1], [], []>} : vector<8x32xf32>, vector<32x128xf32>, vector<8x128xf32> -> vector<8x128xf32>
    %475 = arith.addf %473, %474 : vector<8x128xf32>
    %476 = vector.extract_strided_slice %475 {offsets = [0, 0], sizes = [8, 32], strides = [1, 1]} : vector<8x128xf32> to vector<8x32xf32>
    %477 = arith.negf %476 : vector<8x32xf32>
    %478 = math.exp %477 : vector<8x32xf32>
    %cst_126 = arith.constant 1.000000e+00 : f32
    %479 = vector.broadcast %cst_126 : f32 to vector<8x32xf32>
    %480 = arith.addf %479, %478 : vector<8x32xf32>
    %481 = arith.divf %479, %480 : vector<8x32xf32>
    %482 = vector.extract_strided_slice %475 {offsets = [0, 32], sizes = [8, 32], strides = [1, 1]} : vector<8x128xf32> to vector<8x32xf32>
    %483 = arith.negf %482 : vector<8x32xf32>
    %484 = math.exp %483 : vector<8x32xf32>
    %cst_127 = arith.constant 1.000000e+00 : f32
    %485 = vector.broadcast %cst_127 : f32 to vector<8x32xf32>
    %486 = arith.addf %485, %484 : vector<8x32xf32>
    %487 = arith.divf %485, %486 : vector<8x32xf32>
    %488 = vector.extract_strided_slice %475 {offsets = [0, 64], sizes = [8, 32], strides = [1, 1]} : vector<8x128xf32> to vector<8x32xf32>
    %489 = math.tanh %488 : vector<8x32xf32>
    %490 = vector.extract_strided_slice %475 {offsets = [0, 96], sizes = [8, 32], strides = [1, 1]} : vector<8x128xf32> to vector<8x32xf32>
    %491 = arith.negf %490 : vector<8x32xf32>
    %492 = math.exp %491 : vector<8x32xf32>
    %cst_128 = arith.constant 1.000000e+00 : f32
    %493 = vector.broadcast %cst_128 : f32 to vector<8x32xf32>
    %494 = arith.addf %493, %492 : vector<8x32xf32>
    %495 = arith.divf %493, %494 : vector<8x32xf32>
    %496 = arith.mulf %487, %467 : vector<8x32xf32>
    %497 = arith.mulf %481, %489 : vector<8x32xf32>
    %498 = arith.addf %496, %497 : vector<8x32xf32>
    %499 = math.tanh %498 : vector<8x32xf32>
    %500 = arith.mulf %495, %499 : vector<8x32xf32>
    %c7_i32_129 = arith.constant 7 : i32
    %c8_i32_130 = arith.constant 8 : i32
    %501 = arith.muli %c7_i32_129, %c8_i32_130 : i32
    %502 = tpu.assume_multiple %501, 8 : i32
    %503 = arith.index_cast %502 : i32 to index
    %c0_131 = arith.constant 0 : index
    %504 = vector.load %arg11[%503, %c0_131] : memref<64x128xf32, #tpu.memory_space<vmem>>, vector<8x128xf32>
    %cst_132 = arith.constant dense<0.000000e+00> : vector<8x128xf32>
    %505 = tpu.matmul %500, %275, %cst_132 {dimension_numbers = #tpu.dot_dimension_numbers<[1], [0], [0], [1], [0, 0, 1, 1], [], []>} : vector<8x32xf32>, vector<32x128xf32>, vector<8x128xf32> -> vector<8x128xf32>
    %506 = arith.addf %504, %505 : vector<8x128xf32>
    %507 = vector.extract_strided_slice %506 {offsets = [0, 0], sizes = [8, 32], strides = [1, 1]} : vector<8x128xf32> to vector<8x32xf32>
    %508 = arith.negf %507 : vector<8x32xf32>
    %509 = math.exp %508 : vector<8x32xf32>
    %cst_133 = arith.constant 1.000000e+00 : f32
    %510 = vector.broadcast %cst_133 : f32 to vector<8x32xf32>
    %511 = arith.addf %510, %509 : vector<8x32xf32>
    %512 = arith.divf %510, %511 : vector<8x32xf32>
    %513 = vector.extract_strided_slice %506 {offsets = [0, 32], sizes = [8, 32], strides = [1, 1]} : vector<8x128xf32> to vector<8x32xf32>
    %514 = arith.negf %513 : vector<8x32xf32>
    %515 = math.exp %514 : vector<8x32xf32>
    %cst_134 = arith.constant 1.000000e+00 : f32
    %516 = vector.broadcast %cst_134 : f32 to vector<8x32xf32>
    %517 = arith.addf %516, %515 : vector<8x32xf32>
    %518 = arith.divf %516, %517 : vector<8x32xf32>
    %519 = vector.extract_strided_slice %506 {offsets = [0, 64], sizes = [8, 32], strides = [1, 1]} : vector<8x128xf32> to vector<8x32xf32>
    %520 = math.tanh %519 : vector<8x32xf32>
    %521 = vector.extract_strided_slice %506 {offsets = [0, 96], sizes = [8, 32], strides = [1, 1]} : vector<8x128xf32> to vector<8x32xf32>
    %522 = arith.negf %521 : vector<8x32xf32>
    %523 = math.exp %522 : vector<8x32xf32>
    %cst_135 = arith.constant 1.000000e+00 : f32
    %524 = vector.broadcast %cst_135 : f32 to vector<8x32xf32>
    %525 = arith.addf %524, %523 : vector<8x32xf32>
    %526 = arith.divf %524, %525 : vector<8x32xf32>
    %527 = arith.mulf %518, %498 : vector<8x32xf32>
    %528 = arith.mulf %512, %520 : vector<8x32xf32>
    %529 = arith.addf %527, %528 : vector<8x32xf32>
    %530 = math.tanh %529 : vector<8x32xf32>
    %531 = arith.mulf %526, %530 : vector<8x32xf32>
    %c8_i32_136 = arith.constant 8 : i32
    %c0_137 = arith.constant 0 : index
    %c0_138 = arith.constant 0 : index
    %532 = vector.load %arg7[%c0_137, %c0_138] : memref<32x128xf32, #tpu.memory_space<vmem>>, vector<32x128xf32>
    %cst_139 = arith.constant dense<0.000000e+00> : vector<8x128xf32>
    %533 = tpu.matmul %531, %532, %cst_139 {dimension_numbers = #tpu.dot_dimension_numbers<[1], [0], [0], [1], [0, 0, 1, 1], [], []>} : vector<8x32xf32>, vector<32x128xf32>, vector<8x128xf32> -> vector<8x128xf32>
    %c0_140 = arith.constant 0 : index
    %c0_141 = arith.constant 0 : index
    %534 = vector.load %arg8[%c0_140, %c0_141] : memref<1x128xf32, #tpu.memory_space<vmem>>, vector<1x128xf32>
    %535 = vector.broadcast %534 : vector<1x128xf32> to vector<8x128xf32>
    %536 = arith.addf %533, %535 : vector<8x128xf32>
    %c0_142 = arith.constant 0 : index
    %c0_143 = arith.constant 0 : index
    %537 = vector.load %arg9[%c0_142, %c0_143] : memref<8x128xf32, #tpu.memory_space<vmem>>, vector<8x128xf32>
    tpu.vector_store %arg9[%c0_142, %c0_143], %536 {strides = array<i32>} : memref<8x128xf32, #tpu.memory_space<vmem>>, vector<8x128xf32>,
    return
  }
}

</mosaic_0001>

<bundles_post_ra>
// kernel: lstm_model_ttt_forward.1
= control target key start
LH: loop header
LB: loop body
LE: loop exit
PB: predicated region body
PF: predicated region fallthrough
CT: control target
= control target key end

     0   :  { %vm53_vm0 = vcmask 130048   ;;  %v2712_v0 = vmov 0.0|0.0   ;;  %vm2713_vm1 = vmmov 0   ;;  %v2714_v4 = vmov 0.0   ;;  %s2715_s25 = smov 64   ;;  %s3127_s1 = inlined_call_operand.vmem [shape: f32[16,128], index: 1, kind: input, shape index: {}]   ;;  %s3128_s2 = inlined_call_operand.vmem [shape: f32[32,128], index: 2, kind: input, shape index: {}]   ;;  %s3129_s0 = inlined_call_operand.vmem [shape: f32[64,16], index: 0, kind: input, shape index: {}]   ;;  %s3130_s3 = inlined_call_operand.vmem [shape: f32[1,128], index: 3, kind: input, shape index: {}]   ;;  %s3131_s4 = inlined_call_operand.vmem [shape: f32[32,128], index: 4, kind: input, shape index: {}]   ;;  %s3132_s5 = inlined_call_operand.vmem [shape: f32[32,128], index: 5, kind: input, shape index: {}]   ;;  %s3133_s6 = inlined_call_operand.vmem [shape: f32[1,128], index: 6, kind: input, shape index: {}]   ;;  %s3134_s7 = inlined_call_operand.vmem [shape: f32[32,128], index: 7, kind: input, shape index: {}]   ;;  %s3135_s8 = inlined_call_operand.vmem [shape: f32[1,128], index: 8, kind: input, shape index: {}]   ;;  %s3136_s9 = inlined_call_operand.vmem [shape: f32[8,128], index: 9, kind: output, shape index: {}]  }
   0x1   :  { %2469 = vmatprep.subr.bf16.mxu1 %v2712_v0  ;;  %v32_v1 = vld [vmem:[%s3127_s1] sm:$0xff]  ;;  %v33_v2 = vld [vmem:[%s3127_s1 + $0x8] sm:$0xff]  ;;  %2266 = vmatprep.mubr.msk.f32.mxu1 %vm2713_vm1, %v2714_v4  ;;  %v36_v9 = vld [vmem:[%s3128_s2 + $0x10] sm:$0xff]  ;;  %vm192_vm2 = vcmask 261120  }
   0x2   :  { %v34_v3 = vld [vmem:[%s3128_s2] sm:$0xff]  ;;  %v2465_v5 = vpack.c.bf16 %v33_v2, %v32_v1  ;;  %v35_v6 = vld [vmem:[%s3128_s2 + $0x8] sm:$0xff]  ;;  %v37_v10 = vld [vmem:[%s3128_s2 + $0x18] sm:$0xff] }
   0x3   :  { %v39_v7 = vld [vmem:[%s3129_s0] sm:$0xff]  ;;  %v2785_v8 = vpack.c.bf16 %v35_v6, %v34_v3  ;;  %v40_v11 = vld [vmem:[%s3129_s0 + $0x8] sm:$0xff]  ;;  %v2798_v12 = vpack.c.bf16 %v37_v10, %v36_v9  ;;  %v41_v48 = vld [vmem:[%s3129_s0 + $0x10] sm:$0xff] }
   0x4   :  { %2246 = vmatprep.mubr.msk.f32.mxu0 %vm53_vm0, %v39_v7  ;;  %2466 = vmatprep.subr.bf16.mxu0 %v2465_v5  ;;  %v2819_v13 = vld [vmem:[%s3130_s3] ss:$0 sm:$0xff]  ;;  %s2716_s3 = smov 32   ;;  %v42_v49 = vld [vmem:[%s3129_s0 + $0x18] sm:$0xff]  ;;  %v44_v51 = vld [vmem:[%s3129_s0 + $0x28] sm:$0xff] }
   0x5   :  { %2471 = vmatpush3.bf16.msra.mxu1 %v2785_v8  ;;  %2468 = vmatpush3.bf16.msra.mxu0 %v2465_v5  ;;  %v43_v50 = vld [vmem:[%s3129_s0 + $0x20] sm:$0xff]  ;;  %v45_v52 = vld [vmem:[%s3129_s0 + $0x30] sm:$0xff]  ;;  %v46_v53 = vld [vmem:[%s3129_s0 + $0x38] sm:$0xff] }
   0x6   :  { %2472 = vmatprep.subr.bf16.mxu1 %v2712_v0  ;;  %2481 = vmatprep.subr.bf16.mxu0 %v2712_v0 }
   0x8   :  { %2247 = vmatmul.mubr.msk.f32.vlgmr.msra.gmra.mrb[0].mxu0 %vm53_vm0, %v40_v11 }
   0x9   :  { %2474 = vmatpush3.bf16.msra.mxu1 %v2798_v12  ;;  %2483 = vmatpush3.bf16.msra.mxu0 %v2785_v8 }
   0xa   :  { %2475 = vmatprep.subr.bf16.mxu1 %v2712_v0  ;;  %2484 = vmatprep.subr.bf16.mxu0 %v2712_v0 }
   0xb   :  { %2249 = vmatprep.mubr.msk.f32.mxu0 %vm53_vm0, %v41_v48 }
   0xc   :  { %2267 = vmatmul.mubr.f32.vlgmr.msra.gmra.mrb[0].mxu1 %v2714_v4  ;;  %2250 = vmatmul.mubr.msk.f32.gmra.mrb[2].mxu0 %vm53_vm0, %v42_v49 }
   0xd   :  { %2477 = vmatpush3.bf16.msra.mxu1 %v2785_v8  ;;  %2277 = vmatprep.mubr.msk.f32.mxu1 %vm2713_vm1, %v2714_v4 }
   0xe   :  { %2478 = vmatprep.subr.bf16.mxu1 %v2712_v0  ;;  %2486 = vmatpush3.bf16.msra.mxu0 %v2798_v12 }
   0xf   :  { %2493 = vmatprep.subr.bf16.mxu0 %v2712_v0  ;;  %2252 = vmatprep.mubr.msk.f32.mxu0 %vm53_vm0, %v43_v50 }
  0x10   :  { %2253 = vmatmul.mubr.msk.f32.gmra.mrb[4].mxu0 %vm53_vm0, %v44_v51 }
  0x11   :  { %2480 = vmatpush3.bf16.msra.mxu1 %v2798_v12  ;;  %2255 = vmatprep.mubr.msk.f32.mxu0 %vm53_vm0, %v45_v52 }
  0x12   :  { %2487 = vmatprep.subr.bf16.mxu1 %v2712_v0 }
  0x14   :  { %2256 = vmatmul.mubr.msk.f32.gmra.mrb[6].mxu0 %vm53_vm0, %v46_v53 }
  0x15   :  { %2288 = vmatprep.mubr.msk.f32.mxu0 %vm2713_vm1, %v2714_v4 }
  0xdb   :  { %v2248_v14 = vpop.f32.mrb[0].mxu0 }
  0xdc   :  { %v144_v15 = vpop.f32.mrb[1].mxu0  ;;  %v150_v34 = vadd.f32 %v2248_v14, %v2819_v13 }
  0xdd   :  { %v145_v16 = vadd.f32 %v2819_v13, %v144_v15 }
  0xdf   :  { %v262_v17 = vpop.f32.mrb[0].mxu1  ;;  %v2251_v57 = vpop.f32.mrb[2].mxu0 }
  0xe0   :  { %v266_v18 = vadd.f32 %v262_v17, %v145_v16  ;;  %v2268_v19 = vpop.f32.mrb[1].mxu1  ;;  %v154_v58 = vpop.f32.mrb[3].mxu0 }
  0xe1   :  { %v155_v1 = vadd.f32 %v2819_v13, %v154_v58 }
  0xe2   :  { %2584 = vtanh.f32 %v266_v18  ;;  %v2094_v21 = vmul.f32 -1.442695, %v266_v18 }
  0xe3   :  { %v2865_v59 = vpop.f32.mrb[4].mxu0 }
  0xe4   :  { %2586 = vpow2.f32 %v2094_v21  ;;  %v2867_v60 = vpop.f32.mrb[5].mxu0 }
  0xe7   :  { %v2869_v61 = vpop.f32.mrb[6].mxu0 }
  0xe8   :  { %v2871_v62 = vpop.f32.mrb[7].mxu0 }
  0xec   :  { %v2585_v20 = vpop.eup %2584 }
  0xed   :  { %276 = vrot.lane.b32.xlu0 %v2585_v20, %s2715_s25 }
  0xee   :  { %v2587_v22 = vpop.eup %2586 }
  0xef   :  { %v270_v23 = vadd.f32 1.0, %v2587_v22 }
  0xf1   :  { %2588 = vrcp.f32 %v270_v23  ;;  %v160_v23 = vadd.f32 %v2251_v57, %v2819_v13 }
  0xfb   :  { %v2589_v24 = vpop.eup %2588 }
  0xfc   :  { %v274_v27 = vmul.f32 0.0, %v2589_v24 }
 0x15f   :  { %v277_v25 = vpop.permute.xlu0 %276 }
 0x160   :  { %v279_v26 = vmul.f32 %v2589_v24, %v277_v25 }
 0x162   :  { %281 = vrot.lane.b32.xlu0 %v279_v26, %s2716_s3 }
 0x1d4   :  { %v282_v28 = vpop.permute.xlu0 %281 }
 0x1d5   :  { %v284_v29 = vadd.f32 %v282_v28, %v274_v27 }
 0x1d7   :  { %2590 = vtanh.f32 %v284_v29 }
 0x1e1   :  { %v2591_v30 = vpop.eup %2590 }
 0x1e2   :  { %287 = vrot.lane.b32.xlu1 %v2591_v30, %s2715_s25 }
 0x254   :  { %v288_v31 = vpop.permute.xlu1 %287 }
 0x255   :  { %v290_v32 = vmul.f32 %v2589_v24, %v288_v31 }
 0x257   :  { %292 = vrot.lane.b32.xlu1 %v290_v32, %s2716_s3 }
 0x2c9   :  { %v293_v33 = vpop.permute.xlu1 %292 }
 0x2ca   :  { %295 = vst.msk [vmem:[#allocation2] sm:$0xff] %vm192_vm2, %v293_v33  ;;  %2278 = vmatmul.mubr.msk.f32.vlgmr.msra.gmra.mrb[2].mxu1 %vm192_vm2, %v293_v33 }
 0x2cb   :  { %2489 = vmatpush3.bf16.msra.mxu1 %v2785_v8  ;;  %2299 = vmatprep.mubr.msk.f32.mxu1 %vm2713_vm1, %v2714_v4 }
 0x2cc   :  { %2490 = vmatprep.subr.bf16.mxu1 %v2712_v0 }
 0x2cf   :  { %2492 = vmatpush3.bf16.msra.mxu1 %v2798_v12 }
 0x2d0   :  { %2499 = vmatprep.subr.bf16.mxu1 %v2712_v0 }
 0x39d   :  { %v366_v35 = vpop.f32.mrb[2].mxu1 }
 0x39e   :  { %v370_v36 = vadd.f32 %v366_v35, %v150_v34  ;;  %v2279_v37 = vpop.f32.mrb[3].mxu1 }
 0x3a0   :  { %2592 = vtanh.f32 %v370_v36  ;;  %v2096_v39 = vmul.f32 -1.442695, %v370_v36 }
 0x3a2   :  { %2594 = vpow2.f32 %v2096_v39 }
 0x3aa   :  { %v2593_v38 = vpop.eup %2592 }
 0x3ab   :  { %380 = vrot.lane.b32.xlu0 %v2593_v38, %s2715_s25 }
 0x3ac   :  { %v2595_v40 = vpop.eup %2594 }
 0x3ad   :  { %v374_v41 = vadd.f32 1.0, %v2595_v40 }
 0x3af   :  { %2596 = vrcp.f32 %v374_v41  ;;  %v165_v41 = vadd.f32 %v2819_v13, %v2867_v60  ;;  %v170_v60 = vadd.f32 %v2865_v59, %v2819_v13 }
 0x3b9   :  { %v2597_v42 = vpop.eup %2596 }
 0x3ba   :  { %v378_v45 = vmul.f32 %v2597_v42, %v284_v29 }
 0x41d   :  { %v381_v43 = vpop.permute.xlu0 %380 }
 0x41e   :  { %v383_v44 = vmul.f32 %v2597_v42, %v381_v43 }
 0x420   :  { %385 = vrot.lane.b32.xlu1 %v383_v44, %s2716_s3 }
 0x492   :  { %v386_v46 = vpop.permute.xlu1 %385 }
 0x493   :  { %v388_v47 = vadd.f32 %v386_v46, %v378_v45 }
 0x495   :  { %2598 = vtanh.f32 %v388_v47 }
 0x49f   :  { %v2599_v54 = vpop.eup %2598 }
 0x4a0   :  { %391 = vrot.lane.b32.xlu0 %v2599_v54, %s2715_s25 }
 0x512   :  { %v392_v55 = vpop.permute.xlu0 %391 }
 0x513   :  { %v394_v56 = vmul.f32 %v2597_v42, %v392_v55 }
 0x515   :  { %396 = vrot.lane.b32.xlu1 %v394_v56, %s2716_s3 }
 0x587   :  { %v397_v63 = vpop.permute.xlu1 %396 }
 0x588   :  { %400 = vst.msk [vmem:[#allocation2 + $0x8] sm:$0xff] %vm192_vm2, %v397_v63  ;;  %2289 = vmatmul.mubr.msk.f32.vlgmr.msra.gmra.mrb[8].mxu0 %vm192_vm2, %v397_v63 }
 0x589   :  { %2495 = vmatpush3.bf16.msra.mxu0 %v2785_v8  ;;  %2310 = vmatprep.mubr.msk.f32.mxu0 %vm2713_vm1, %v2714_v4 }
 0x58a   :  { %2496 = vmatprep.subr.bf16.mxu0 %v2712_v0 }
 0x58d   :  { %2498 = vmatpush3.bf16.msra.mxu0 %v2798_v12 }
 0x58e   :  { %2505 = vmatprep.subr.bf16.mxu0 %v2712_v0 }
 0x65b   :  { %v471_v2 = vpop.f32.mrb[8].mxu0 }
 0x65c   :  { %v475_v3 = vadd.f32 %v471_v2, %v155_v1  ;;  %v2290_v5 = vpop.f32.mrb[9].mxu0 }
 0x65e   :  { %2600 = vtanh.f32 %v475_v3  ;;  %v2098_v7 = vmul.f32 -1.442695, %v475_v3 }
 0x660   :  { %2602 = vpow2.f32 %v2098_v7 }
 0x668   :  { %v2601_v6 = vpop.eup %2600 }
 0x669   :  { %485 = vrot.lane.b32.xlu0 %v2601_v6, %s2715_s25 }
 0x66a   :  { %v2603_v9 = vpop.eup %2602 }
 0x66b   :  { %v479_v10 = vadd.f32 1.0, %v2603_v9 }
 0x66d   :  { %2604 = vrcp.f32 %v479_v10 }
 0x677   :  { %v2605_v11 = vpop.eup %2604 }
 0x678   :  { %v483_v16 = vmul.f32 %v2605_v11, %v388_v47 }
 0x6db   :  { %v486_v14 = vpop.permute.xlu0 %485 }
 0x6dc   :  { %v488_v15 = vmul.f32 %v2605_v11, %v486_v14  ;;  %v1031_v14 = vld [vmem:[%s3131_s4] sm:$0xff] }
 0x6de   :  { %490 = vrot.lane.b32.xlu1 %v488_v15, %s2716_s3  ;;  %v1032_v15 = vld [vmem:[%s3131_s4 + $0x8] sm:$0xff] }
 0x750   :  { %v491_v17 = vpop.permute.xlu1 %490 }
 0x751   :  { %v493_v18 = vadd.f32 %v491_v17, %v483_v16  ;;  %v2517_v16 = vpack.c.bf16 %v1032_v15, %v1031_v14 }
 0x753   :  { %2606 = vtanh.f32 %v493_v18 }
 0x75d   :  { %v2607_v19 = vpop.eup %2606 }
 0x75e   :  { %496 = vrot.lane.b32.xlu0 %v2607_v19, %s2715_s25 }
 0x7d0   :  { %v497_v20 = vpop.permute.xlu0 %496 }
 0x7d1   :  { %v499_v21 = vmul.f32 %v2605_v11, %v497_v20  ;;  %v1033_v20 = vld [vmem:[%s3131_s4 + $0x10] sm:$0xff] }
 0x7d3   :  { %501 = vrot.lane.b32.xlu1 %v499_v21, %s2716_s3  ;;  %v1034_v21 = vld [vmem:[%s3131_s4 + $0x18] sm:$0xff] }
 0x845   :  { %v502_v22 = vpop.permute.xlu1 %501 }
 0x846   :  { %505 = vst.msk [vmem:[#allocation2 + $0x10] sm:$0xff] %vm192_vm2, %v502_v22  ;;  %2300 = vmatmul.mubr.msk.f32.vlgmr.msra.gmra.mrb[4].mxu1 %vm192_vm2, %v502_v22  ;;  %v2521_v22 = vpack.c.bf16 %v1034_v21, %v1033_v20 }
 0x847   :  { %2501 = vmatpush3.bf16.msra.mxu1 %v2785_v8  ;;  %2321 = vmatprep.mubr.msk.f32.mxu1 %vm2713_vm1, %v2714_v4 }
 0x848   :  { %2502 = vmatprep.subr.bf16.mxu1 %v2712_v0 }
 0x84b   :  { %2504 = vmatpush3.bf16.msra.mxu1 %v2798_v12 }
 0x84c   :  { %2511 = vmatprep.subr.bf16.mxu1 %v2712_v0 }
 0x919   :  { %v576_v24 = vpop.f32.mrb[4].mxu1 }
 0x91a   :  { %v580_v25 = vadd.f32 %v576_v24, %v160_v23  ;;  %v2301_v26 = vpop.f32.mrb[5].mxu1  ;;  %v1040_v24 = vld [vmem:[#allocation2] sm:$0xff] }
 0x91b   :  { %v1042_v26 = vld [vmem:[#allocation2 + $0x10] sm:$0xff] }
 0x91c   :  { %2608 = vtanh.f32 %v580_v25  ;;  %v2100_v28 = vmul.f32 -1.442695, %v580_v25  ;;  %v1041_v25 = vld [vmem:[#allocation2 + $0x8] sm:$0xff] }
 0x91e   :  { %2610 = vpow2.f32 %v2100_v28 }
 0x926   :  { %v2609_v27 = vpop.eup %2608 }
 0x927   :  { %590 = vrot.lane.b32.xlu0 %v2609_v27, %s2715_s25 }
 0x928   :  { %v2611_v29 = vpop.eup %2610 }
 0x929   :  { %v584_v30 = vadd.f32 1.0, %v2611_v29 }
 0x92b   :  { %2612 = vrcp.f32 %v584_v30  ;;  %v175_v30 = vadd.f32 %v2819_v13, %v2871_v62 }
 0x935   :  { %v2613_v31 = vpop.eup %2612 }
 0x936   :  { %v588_v34 = vmul.f32 %v2613_v31, %v493_v18 }
 0x999   :  { %v591_v32 = vpop.permute.xlu0 %590 }
 0x99a   :  { %v593_v33 = vmul.f32 %v2613_v31, %v591_v32 }
 0x99c   :  { %595 = vrot.lane.b32.xlu1 %v593_v33, %s2716_s3 }
 0xa0e   :  { %v596_v35 = vpop.permute.xlu1 %595 }
 0xa0f   :  { %v598_v36 = vadd.f32 %v596_v35, %v588_v34 }
 0xa11   :  { %2614 = vtanh.f32 %v598_v36 }
 0xa1b   :  { %v2615_v37 = vpop.eup %2614 }
 0xa1c   :  { %601 = vrot.lane.b32.xlu0 %v2615_v37, %s2715_s25 }
 0xa8e   :  { %v602_v38 = vpop.permute.xlu0 %601 }
 0xa8f   :  { %v604_v39 = vmul.f32 %v2613_v31, %v602_v38 }
 0xa91   :  { %606 = vrot.lane.b32.xlu1 %v604_v39, %s2716_s3 }
 0xb03   :  { %v607_v40 = vpop.permute.xlu1 %606 }
 0xb04   :  { %610 = vst.msk [vmem:[#allocation2 + $0x18] sm:$0xff] %vm192_vm2, %v607_v40  ;;  %2311 = vmatmul.mubr.msk.f32.vlgmr.msra.gmra.mrb[10].mxu0 %vm192_vm2, %v607_v40 }
 0xb05   :  { %2507 = vmatpush3.bf16.msra.mxu0 %v2785_v8  ;;  %2332 = vmatprep.mubr.msk.f32.mxu0 %vm2713_vm1, %v2714_v4 }
 0xb06   :  { %2508 = vmatprep.subr.bf16.mxu0 %v2712_v0 }
 0xb09   :  { %2510 = vmatpush3.bf16.msra.mxu0 %v2798_v12 }
 0xb0a   :  { %2518 = vmatprep.subr.bf16.mxu0 %v2517_v16 }
 0xb0b   :  { %v1043_v27 = vld [vmem:[#allocation2 + $0x18] sm:$0xff] }
 0xbd7   :  { %v681_v42 = vpop.f32.mrb[10].mxu0 }
 0xbd8   :  { %v685_v43 = vadd.f32 %v681_v42, %v165_v41  ;;  %v2312_v44 = vpop.f32.mrb[11].mxu0 }
 0xbda   :  { %2616 = vtanh.f32 %v685_v43  ;;  %v2102_v46 = vmul.f32 -1.442695, %v685_v43 }
 0xbdc   :  { %2618 = vpow2.f32 %v2102_v46 }
 0xbe4   :  { %v2617_v45 = vpop.eup %2616 }
 0xbe5   :  { %695 = vrot.lane.b32.xlu0 %v2617_v45, %s2715_s25 }
 0xbe6   :  { %v2619_v47 = vpop.eup %2618 }
 0xbe7   :  { %v689_v48 = vadd.f32 1.0, %v2619_v47 }
 0xbe9   :  { %2620 = vrcp.f32 %v689_v48 }
 0xbf3   :  { %v2621_v49 = vpop.eup %2620 }
 0xbf4   :  { %v693_v52 = vmul.f32 %v2621_v49, %v598_v36 }
 0xc57   :  { %v696_v50 = vpop.permute.xlu0 %695 }
 0xc58   :  { %v698_v51 = vmul.f32 %v2621_v49, %v696_v50  ;;  %v1035_v50 = vld [vmem:[%s3132_s5] sm:$0xff] }
 0xc5a   :  { %700 = vrot.lane.b32.xlu1 %v698_v51, %s2716_s3  ;;  %v1036_v51 = vld [vmem:[%s3132_s5 + $0x8] sm:$0xff] }
 0xccc   :  { %v701_v53 = vpop.permute.xlu1 %700 }
 0xccd   :  { %v703_v54 = vadd.f32 %v701_v53, %v693_v52  ;;  %v2971_v52 = vpack.c.bf16 %v1036_v51, %v1035_v50  ;;  %v1037_v53 = vld [vmem:[%s3132_s5 + $0x10] sm:$0xff] }
 0xccf   :  { %2622 = vtanh.f32 %v703_v54 }
 0xcd9   :  { %v2623_v55 = vpop.eup %2622 }
 0xcda   :  { %706 = vrot.lane.b32.xlu0 %v2623_v55, %s2715_s25 }
 0xd4c   :  { %v707_v56 = vpop.permute.xlu0 %706 }
 0xd4d   :  { %v709_v57 = vmul.f32 %v2621_v49, %v707_v56 }
 0xd4f   :  { %711 = vrot.lane.b32.xlu1 %v709_v57, %s2716_s3 }
 0xdc1   :  { %v712_v58 = vpop.permute.xlu1 %711 }
 0xdc2   :  { %715 = vst.msk [vmem:[#allocation2 + $0x20] sm:$0xff] %vm192_vm2, %v712_v58  ;;  %2322 = vmatmul.mubr.msk.f32.vlgmr.msra.gmra.mrb[6].mxu1 %vm192_vm2, %v712_v58 }
 0xdc3   :  { %2513 = vmatpush3.bf16.msra.mxu1 %v2785_v8  ;;  %2343 = vmatprep.mubr.msk.f32.mxu1 %vm2713_vm1, %v2714_v4 }
 0xdc4   :  { %2514 = vmatprep.subr.bf16.mxu1 %v2712_v0 }
 0xdc7   :  { %2516 = vmatpush3.bf16.msra.mxu1 %v2798_v12 }
 0xdc8   :  { %2525 = vmatprep.subr.bf16.mxu1 %v2712_v0 }
 0xdc9   :  { %v1044_v28 = vld [vmem:[#allocation2 + $0x20] sm:$0xff] }
 0xe95   :  { %v786_v63 = vpop.f32.mrb[6].mxu1 }
 0xe96   :  { %v790_v1 = vadd.f32 %v786_v63, %v170_v60  ;;  %v2323_v2 = vpop.f32.mrb[7].mxu1  ;;  %v180_v63 = vadd.f32 %v2869_v61, %v2819_v13 }
 0xe98   :  { %2624 = vtanh.f32 %v790_v1  ;;  %v2104_v8 = vmul.f32 -1.442695, %v790_v1 }
 0xe9a   :  { %2626 = vpow2.f32 %v2104_v8  ;;  %v3007_v8 = vld [vmem:[%s3133_s6] ss:$0 sm:$0xff] }
 0xea2   :  { %v2625_v3 = vpop.eup %2624 }
 0xea3   :  { %800 = vrot.lane.b32.xlu0 %v2625_v3, %s2715_s25 }
 0xea4   :  { %v2627_v5 = vpop.eup %2626 }
 0xea5   :  { %v794_v6 = vadd.f32 1.0, %v2627_v5 }
 0xea7   :  { %2628 = vrcp.f32 %v794_v6 }
 0xeb1   :  { %v2629_v7 = vpop.eup %2628 }
 0xeb2   :  { %v798_v10 = vmul.f32 %v2629_v7, %v703_v54  ;;  %v1038_v54 = vld [vmem:[%s3132_s5 + $0x18] sm:$0xff] }
 0xeb3   :  { %v2981_v55 = vpack.c.bf16 %v1038_v54, %v1037_v53 }
 0xf15   :  { %v801_v9 = vpop.permute.xlu0 %800 }
 0xf16   :  { %v803_v12 = vmul.f32 %v2629_v7, %v801_v9 }
 0xf18   :  { %805 = vrot.lane.b32.xlu1 %v803_v12, %s2716_s3 }
 0xf8a   :  { %v806_v11 = vpop.permute.xlu1 %805 }
 0xf8b   :  { %v808_v59 = vadd.f32 %v806_v11, %v798_v10 }
 0xf8d   :  { %2630 = vtanh.f32 %v808_v59 }
 0xf97   :  { %v2631_v17 = vpop.eup %2630 }
 0xf98   :  { %811 = vrot.lane.b32.xlu0 %v2631_v17, %s2715_s25 }
0x100a   :  { %v812_v18 = vpop.permute.xlu0 %811 }
0x100b   :  { %v814_v19 = vmul.f32 %v2629_v7, %v812_v18 }
0x100d   :  { %816 = vrot.lane.b32.xlu1 %v814_v19, %s2716_s3 }
0x107f   :  { %v817_v23 = vpop.permute.xlu1 %816 }
0x1080   :  { %820 = vst.msk [vmem:[#allocation2 + $0x28] sm:$0xff] %vm192_vm2, %v817_v23  ;;  %2333 = vmatmul.mubr.msk.f32.vlgmr.msra.gmra.mrb[12].mxu0 %vm192_vm2, %v817_v23 }
0x1081   :  { %2520 = vmatpush3.bf16.msra.mxu0 %v2517_v16  ;;  %2354 = vmatprep.mubr.msk.f32.mxu0 %vm192_vm2, %v1040_v24 }
0x1082   :  { %2522 = vmatprep.subr.bf16.mxu0 %v2521_v22 }
0x1085   :  { %2524 = vmatpush3.bf16.msra.mxu0 %v2521_v22 }
0x1086   :  { %2537 = vmatprep.subr.bf16.mxu0 %v2712_v0 }
0x1087   :  { %v1045_v29 = vld [vmem:[#allocation2 + $0x28] sm:$0xff] }
0x1088   :  { %2355 = vmatmul.mubr.msk.f32.vlgmr.msra.gmra.mrb[14].mxu0 %vm192_vm2, %v1041_v25 }
0x1089   :  { %2357 = vmatprep.mubr.msk.f32.mxu0 %vm192_vm2, %v1042_v26  ;;  %2539 = vmatpush3.bf16.msra.mxu0 %v2971_v52 }
0x108a   :  { %2540 = vmatprep.subr.bf16.mxu0 %v2712_v0 }
0x108c   :  { %2358 = vmatmul.mubr.msk.f32.gmra.mrb[16].mxu0 %vm192_vm2, %v1043_v27 }
0x108d   :  { %2360 = vmatprep.mubr.msk.f32.mxu0 %vm192_vm2, %v1044_v28  ;;  %2542 = vmatpush3.bf16.msra.mxu0 %v2981_v55 }
0x108e   :  { %2549 = vmatprep.subr.bf16.mxu0 %v2712_v0 }
0x1090   :  { %2361 = vmatmul.mubr.msk.f32.gmra.mrb[18].mxu0 %vm192_vm2, %v1045_v29 }
0x1153   :  { %v891_v31 = vpop.f32.mrb[12].mxu0 }
0x1154   :  { %v895_v32 = vadd.f32 %v891_v31, %v175_v30  ;;  %v2334_v33 = vpop.f32.mrb[13].mxu0 }
0x1156   :  { %2632 = vtanh.f32 %v895_v32  ;;  %v2106_v41 = vmul.f32 -1.442695, %v895_v32 }
0x1158   :  { %2634 = vpow2.f32 %v2106_v41 }
0x115b   :  { %v2949_v34 = vpop.f32.mrb[14].mxu0 }
0x115c   :  { %v1144_v35 = vpop.f32.mrb[15].mxu0 }
0x115d   :  { %v1145_v5 = vadd.f32 %v3007_v8, %v1144_v35 }
0x115f   :  { %v2951_v36 = vpop.f32.mrb[16].mxu0 }
0x1160   :  { %v2633_v37 = vpop.eup %2632  ;;  %v2953_v38 = vpop.f32.mrb[17].mxu0 }
0x1161   :  { %905 = vrot.lane.b32.xlu0 %v2633_v37, %s2715_s25  ;;  %v1150_v37 = vadd.f32 %v2949_v34, %v3007_v8 }
0x1162   :  { %v2635_v62 = vpop.eup %2634 }
0x1163   :  { %v2956_v39 = vpop.f32.mrb[18].mxu0  ;;  %v899_v42 = vadd.f32 1.0, %v2635_v62 }
0x1164   :  { %v2958_v40 = vpop.f32.mrb[19].mxu0 }
0x1165   :  { %2636 = vrcp.f32 %v899_v42 }
0x116f   :  { %v2637_v43 = vpop.eup %2636 }
0x1170   :  { %v903_v46 = vmul.f32 %v2637_v43, %v808_v59 }
0x11d3   :  { %v906_v44 = vpop.permute.xlu0 %905 }
0x11d4   :  { %v908_v45 = vmul.f32 %v2637_v43, %v906_v44 }
0x11d6   :  { %910 = vrot.lane.b32.xlu1 %v908_v45, %s2716_s3 }
0x1248   :  { %v911_v47 = vpop.permute.xlu1 %910 }
0x1249   :  { %v2961_v48 = vadd.f32 %v911_v47, %v903_v46 }
0x124b   :  { %2638 = vtanh.f32 %v2961_v48 }
0x1255   :  { %v2639_v49 = vpop.eup %2638 }
0x1256   :  { %916 = vrot.lane.b32.xlu0 %v2639_v49, %s2715_s25 }
0x12c8   :  { %v917_v56 = vpop.permute.xlu0 %916 }
0x12c9   :  { %v919_v57 = vmul.f32 %v2637_v43, %v917_v56 }
0x12cb   :  { %921 = vrot.lane.b32.xlu1 %v919_v57, %s2716_s3 }
0x133d   :  { %v922_v58 = vpop.permute.xlu1 %921 }
0x133e   :  { %925 = vst.msk [vmem:[#allocation2 + $0x30] sm:$0xff] %vm192_vm2, %v922_v58  ;;  %2344 = vmatmul.mubr.msk.f32.vlgmr.msra.gmra.mrb[8].mxu1 %vm192_vm2, %v922_v58 }
0x133f   :  { %2527 = vmatpush3.bf16.msra.mxu1 %v2971_v52  ;;  %2374 = vmatprep.mubr.msk.f32.mxu1 %vm2713_vm1, %v2714_v4 }
0x1340   :  { %2528 = vmatprep.subr.bf16.mxu1 %v2712_v0 }
0x1343   :  { %2530 = vmatpush3.bf16.msra.mxu1 %v2981_v55 }
0x1344   :  { %2531 = vmatprep.subr.bf16.mxu1 %v2712_v0 }
0x1345   :  { %v1046_v60 = vld [vmem:[#allocation2 + $0x30] sm:$0xff] }
0x1346   :  { %2375 = vmatmul.mubr.f32.vlgmr.msra.gmra.mrb[10].mxu1 %v2714_v4  ;;  %2363 = vmatprep.mubr.msk.f32.mxu0 %vm192_vm2, %v1046_v60 }
0x1347   :  { %2533 = vmatpush3.bf16.msra.mxu1 %v2971_v52  ;;  %2385 = vmatprep.mubr.msk.f32.mxu1 %vm2713_vm1, %v2714_v4 }
0x1348   :  { %2534 = vmatprep.subr.bf16.mxu1 %v2712_v0 }
0x134b   :  { %2536 = vmatpush3.bf16.msra.mxu1 %v2981_v55 }
0x134c   :  { %2543 = vmatprep.subr.bf16.mxu1 %v2712_v0 }
0x1411   :  { %v996_v1 = vpop.f32.mrb[8].mxu1 }
0x1412   :  { %v1000_v2 = vadd.f32 %v996_v1, %v180_v63  ;;  %v2345_v3 = vpop.f32.mrb[9].mxu1 }
0x1414   :  { %v2108_v20 = vmul.f32 -1.442695, %v1000_v2 }
0x1419   :  { %v1258_v6 = vpop.f32.mrb[10].mxu1 }
0x141a   :  { %v1262_v7 = vadd.f32 %v1258_v6, %v1145_v5  ;;  %v2376_v9 = vpop.f32.mrb[11].mxu1 }
0x141c   :  { %2640 = vtanh.f32 %v1262_v7  ;;  %v2118_v10 = vmul.f32 -1.442695, %v1262_v7 }
0x141e   :  { %2642 = vpow2.f32 %v2118_v10 }
0x1426   :  { %v2641_v12 = vpop.eup %2640 }
0x1427   :  { %1272 = vrot.lane.b32.xlu0 %v2641_v12, %s2715_s25 }
0x1428   :  { %v2643_v13 = vpop.eup %2642 }
0x1429   :  { %v1266_v61 = vadd.f32 1.0, %v2643_v13 }
0x142b   :  { %2644 = vrcp.f32 %v1266_v61 }
0x1435   :  { %v2645_v11 = vpop.eup %2644 }
0x1436   :  { %v1270_v15 = vmul.f32 0.0, %v2645_v11 }
0x1499   :  { %v1273_v59 = vpop.permute.xlu0 %1272 }
0x149a   :  { %v1275_v14 = vmul.f32 %v2645_v11, %v1273_v59 }
0x149c   :  { %1277 = vrot.lane.b32.xlu1 %v1275_v14, %s2716_s3 }
0x150e   :  { %v1278_v16 = vpop.permute.xlu1 %1277 }
0x150f   :  { %v1280_v17 = vadd.f32 %v1278_v16, %v1270_v15 }
0x1511   :  { %2646 = vtanh.f32 %v1280_v17 }
0x1512   :  { %2648 = vtanh.f32 %v1000_v2  ;;  %v1155_v2 = vadd.f32 %v3007_v8, %v2953_v38 }
0x1513   :  { %2650 = vpow2.f32 %v2108_v20 }
0x151b   :  { %v2647_v18 = vpop.eup %2646 }
0x151c   :  { %1283 = vrot.lane.b32.xlu0 %v2647_v18, %s2715_s25  ;;  %v2649_v19 = vpop.eup %2648 }
0x151d   :  { %v2651_v21 = vpop.eup %2650 }
0x151e   :  { %v1004_v22 = vadd.f32 1.0, %v2651_v21 }
0x1520   :  { %1010 = vrot.lane.b32.xlu0 %v2649_v19, %s2715_s25  ;;  %2652 = vrcp.f32 %v1004_v22  ;;  %v1160_v19 = vadd.f32 %v2951_v36, %v3007_v8 }
0x152a   :  { %v2653_v25 = vpop.eup %2652 }
0x152b   :  { %v1008_v29 = vmul.f32 %v2653_v25, %v2961_v48 }
0x158e   :  { %v1284_v23 = vpop.permute.xlu0 %1283 }
0x158f   :  { %v1286_v24 = vmul.f32 %v2645_v11, %v1284_v23 }
0x1591   :  { %1289 = vrot.lane.b32.xlu1 %v1286_v24, %s2716_s3 }
0x1592   :  { %v1011_v26 = vpop.permute.xlu0 %1010 }
0x1593   :  { %v1013_v27 = vmul.f32 %v2653_v25, %v1011_v26 }
0x1595   :  { %1015 = vrot.lane.b32.xlu0 %v1013_v27, %s2716_s3 }
0x1603   :  { %v1290_v28 = vpop.permute.xlu1 %1289 }
0x1604   :  { %2386 = vmatmul.mubr.msk.f32.vlgmr.msra.gmra.mrb[12].mxu1 %vm192_vm2, %v1290_v28 }
0x1605   :  { %2545 = vmatpush3.bf16.msra.mxu1 %v2971_v52  ;;  %2407 = vmatprep.mubr.msk.f32.mxu1 %vm2713_vm1, %v2714_v4 }
0x1606   :  { %2546 = vmatprep.subr.bf16.mxu1 %v2712_v0 }
0x1607   :  { %v1016_v30 = vpop.permute.xlu0 %1015 }
0x1608   :  { %v1018_v31 = vadd.f32 %v1016_v30, %v1008_v29 }
0x1609   :  { %2548 = vmatpush3.bf16.msra.mxu1 %v2981_v55 }
0x160a   :  { %2654 = vtanh.f32 %v1018_v31  ;;  %2555 = vmatprep.subr.bf16.mxu1 %v2712_v0 }
0x1614   :  { %v2655_v32 = vpop.eup %2654 }
0x1615   :  { %1021 = vrot.lane.b32.xlu0 %v2655_v32, %s2715_s25 }
0x1687   :  { %v1022_v33 = vpop.permute.xlu0 %1021 }
0x1688   :  { %v1024_v35 = vmul.f32 %v2653_v25, %v1022_v33 }
0x168a   :  { %1026 = vrot.lane.b32.xlu0 %v1024_v35, %s2716_s3 }
0x16d7   :  { %v1359_v41 = vpop.f32.mrb[12].mxu1 }
0x16d8   :  { %v1363_v62 = vadd.f32 %v1359_v41, %v1150_v37  ;;  %v2387_v42 = vpop.f32.mrb[13].mxu1  ;;  %v1165_v41 = vadd.f32 %v3007_v8, %v2958_v40 }
0x16da   :  { %2656 = vtanh.f32 %v1363_v62  ;;  %v2120_v46 = vmul.f32 -1.442695, %v1363_v62 }
0x16dc   :  { %2658 = vpow2.f32 %v2120_v46 }
0x16e4   :  { %v2657_v43 = vpop.eup %2656 }
0x16e5   :  { %1373 = vrot.lane.b32.xlu1 %v2657_v43, %s2715_s25 }
0x16e6   :  { %v2659_v47 = vpop.eup %2658 }
0x16e7   :  { %v1367_v34 = vadd.f32 1.0, %v2659_v47 }
0x16e9   :  { %2660 = vrcp.f32 %v1367_v34 }
0x16f3   :  { %v2661_v48 = vpop.eup %2660 }
0x16f4   :  { %v1371_v51 = vmul.f32 %v2661_v48, %v1280_v17 }
0x16fc   :  { %v1027_v44 = vpop.permute.xlu0 %1026 }
0x16fd   :  { %1030 = vst.msk [vmem:[#allocation2 + $0x38] sm:$0xff] %vm192_vm2, %v1027_v44 }
0x1704   :  { %v1047_v45 = vld [vmem:[#allocation2 + $0x38] sm:$0xff] }
0x1705   :  { %2364 = vmatmul.mubr.msk.f32.gmra.mrb[20].mxu0 %vm192_vm2, %v1047_v45 }
0x1706   :  { %2396 = vmatprep.mubr.msk.f32.mxu0 %vm2713_vm1, %v2714_v4 }
0x1757   :  { %v1374_v49 = vpop.permute.xlu1 %1373 }
0x1758   :  { %v1376_v50 = vmul.f32 %v2661_v48, %v1374_v49 }
0x175a   :  { %1378 = vrot.lane.b32.xlu1 %v1376_v50, %s2716_s3 }
0x17cc   :  { %v1379_v53 = vpop.permute.xlu1 %1378 }
0x17cd   :  { %v1381_v54 = vadd.f32 %v1379_v53, %v1371_v51 }
0x17cf   :  { %2662 = vtanh.f32 %v1381_v54 }
0x17d8   :  { %v3034_v56 = vpop.f32.mrb[20].mxu0 }
0x17d9   :  { %v2663_v57 = vpop.eup %2662  ;;  %v3036_v58 = vpop.f32.mrb[21].mxu0 }
0x17da   :  { %1384 = vrot.lane.b32.xlu1 %v2663_v57, %s2715_s25 }
0x184c   :  { %v1385_v60 = vpop.permute.xlu1 %1384 }
0x184d   :  { %v1387_v63 = vmul.f32 %v2661_v48, %v1385_v60 }
0x184f   :  { %1390 = vrot.lane.b32.xlu1 %v1387_v63, %s2716_s3  ;;  %v1170_v63 = vadd.f32 %v2956_v39, %v3007_v8 }
0x18c1   :  { %v1391_v1 = vpop.permute.xlu1 %1390 }
0x18c2   :  { %2397 = vmatmul.mubr.msk.f32.vlgmr.msra.gmra.mrb[22].mxu0 %vm192_vm2, %v1391_v1 }
0x18c3   :  { %2551 = vmatpush3.bf16.msra.mxu0 %v2971_v52  ;;  %2418 = vmatprep.mubr.msk.f32.mxu0 %vm2713_vm1, %v2714_v4 }
0x18c4   :  { %2552 = vmatprep.subr.bf16.mxu0 %v2712_v0 }
0x18c7   :  { %2554 = vmatpush3.bf16.msra.mxu0 %v2981_v55 }
0x18c8   :  { %2561 = vmatprep.subr.bf16.mxu0 %v2712_v0 }
0x1995   :  { %v1460_v3 = vpop.f32.mrb[22].mxu0 }
0x1996   :  { %v1464_v5 = vadd.f32 %v1460_v3, %v1155_v2  ;;  %v2398_v6 = vpop.f32.mrb[23].mxu0 }
0x1998   :  { %2664 = vtanh.f32 %v1464_v5  ;;  %v2122_v9 = vmul.f32 -1.442695, %v1464_v5 }
0x199a   :  { %2666 = vpow2.f32 %v2122_v9 }
0x19a2   :  { %v2665_v7 = vpop.eup %2664 }
0x19a3   :  { %1474 = vrot.lane.b32.xlu0 %v2665_v7, %s2715_s25 }
0x19a4   :  { %v2667_v12 = vpop.eup %2666 }
0x19a5   :  { %v1468_v10 = vadd.f32 1.0, %v2667_v12 }
0x19a7   :  { %2668 = vrcp.f32 %v1468_v10 }
0x19b1   :  { %v2669_v13 = vpop.eup %2668 }
0x19b2   :  { %v1472_v59 = vmul.f32 %v2669_v13, %v1381_v54 }
0x1a15   :  { %v1475_v61 = vpop.permute.xlu0 %1474 }
0x1a16   :  { %v1477_v11 = vmul.f32 %v2669_v13, %v1475_v61 }
0x1a18   :  { %1479 = vrot.lane.b32.xlu1 %v1477_v11, %s2716_s3 }
0x1a8a   :  { %v1480_v14 = vpop.permute.xlu1 %1479 }
0x1a8b   :  { %v1482_v38 = vadd.f32 %v1480_v14, %v1472_v59 }
0x1a8d   :  { %2670 = vtanh.f32 %v1482_v38 }
0x1a97   :  { %v2671_v15 = vpop.eup %2670 }
0x1a98   :  { %1485 = vrot.lane.b32.xlu0 %v2671_v15, %s2715_s25 }
0x1b0a   :  { %v1486_v16 = vpop.permute.xlu0 %1485 }
0x1b0b   :  { %v1488_v17 = vmul.f32 %v2669_v13, %v1486_v16 }
0x1b0d   :  { %1491 = vrot.lane.b32.xlu1 %v1488_v17, %s2716_s3 }
0x1b7f   :  { %v1492_v18 = vpop.permute.xlu1 %1491 }
0x1b80   :  { %2408 = vmatmul.mubr.msk.f32.vlgmr.msra.gmra.mrb[14].mxu1 %vm192_vm2, %v1492_v18 }
0x1b81   :  { %2557 = vmatpush3.bf16.msra.mxu1 %v2971_v52  ;;  %2429 = vmatprep.mubr.msk.f32.mxu1 %vm2713_vm1, %v2714_v4 }
0x1b82   :  { %2558 = vmatprep.subr.bf16.mxu1 %v2712_v0 }
0x1b85   :  { %2560 = vmatpush3.bf16.msra.mxu1 %v2981_v55 }
0x1b86   :  { %2567 = vmatprep.subr.bf16.mxu1 %v2712_v0 }
0x1c53   :  { %v1561_v20 = vpop.f32.mrb[14].mxu1 }
0x1c54   :  { %v1565_v21 = vadd.f32 %v1561_v20, %v1160_v19  ;;  %v2409_v22 = vpop.f32.mrb[15].mxu1 }
0x1c56   :  { %2672 = vtanh.f32 %v1565_v21  ;;  %v2124_v24 = vmul.f32 -1.442695, %v1565_v21 }
0x1c58   :  { %2674 = vpow2.f32 %v2124_v24 }
0x1c60   :  { %v2673_v23 = vpop.eup %2672 }
0x1c61   :  { %1575 = vrot.lane.b32.xlu0 %v2673_v23, %s2715_s25 }
0x1c62   :  { %v2675_v25 = vpop.eup %2674 }
0x1c63   :  { %v1569_v26 = vadd.f32 1.0, %v2675_v25 }
0x1c65   :  { %2676 = vrcp.f32 %v1569_v26 }
0x1c6f   :  { %v2677_v27 = vpop.eup %2676 }
0x1c70   :  { %v1573_v30 = vmul.f32 %v2677_v27, %v1482_v38  ;;  %v1175_v38 = vadd.f32 %v3007_v8, %v3036_v58 }
0x1cd3   :  { %v1576_v28 = vpop.permute.xlu0 %1575 }
0x1cd4   :  { %v1578_v29 = vmul.f32 %v2677_v27, %v1576_v28 }
0x1cd6   :  { %1580 = vrot.lane.b32.xlu1 %v1578_v29, %s2716_s3 }
0x1d48   :  { %v1581_v31 = vpop.permute.xlu1 %1580 }
0x1d49   :  { %v1583_v36 = vadd.f32 %v1581_v31, %v1573_v30  ;;  %v1180_v30 = vadd.f32 %v3034_v56, %v3007_v8  ;;  %v1994_v56 = vld [vmem:[%s3134_s7] sm:$0xff] }
0x1d4b   :  { %2678 = vtanh.f32 %v1583_v36 }
0x1d55   :  { %v2679_v32 = vpop.eup %2678 }
0x1d56   :  { %1586 = vrot.lane.b32.xlu0 %v2679_v32, %s2715_s25 }
0x1dc8   :  { %v1587_v33 = vpop.permute.xlu0 %1586 }
0x1dc9   :  { %v1589_v35 = vmul.f32 %v2677_v27, %v1587_v33 }
0x1dcb   :  { %1592 = vrot.lane.b32.xlu1 %v1589_v35, %s2716_s3 }
0x1e3d   :  { %v1593_v37 = vpop.permute.xlu1 %1592 }
0x1e3e   :  { %2419 = vmatmul.mubr.msk.f32.vlgmr.msra.gmra.mrb[24].mxu0 %vm192_vm2, %v1593_v37 }
0x1e3f   :  { %2563 = vmatpush3.bf16.msra.mxu0 %v2971_v52  ;;  %2440 = vmatprep.mubr.msk.f32.mxu0 %vm2713_vm1, %v2714_v4 }
0x1e40   :  { %2564 = vmatprep.subr.bf16.mxu0 %v2712_v0 }
0x1e43   :  { %2566 = vmatpush3.bf16.msra.mxu0 %v2981_v55 }
0x1e44   :  { %2573 = vmatprep.subr.bf16.mxu0 %v2712_v0 }
0x1f11   :  { %v1662_v62 = vpop.f32.mrb[24].mxu0 }
0x1f12   :  { %v1666_v42 = vadd.f32 %v1662_v62, %v1165_v41  ;;  %v2420_v43 = vpop.f32.mrb[25].mxu0 }
0x1f14   :  { %2680 = vtanh.f32 %v1666_v42  ;;  %v2126_v45 = vmul.f32 -1.442695, %v1666_v42 }
0x1f16   :  { %2682 = vpow2.f32 %v2126_v45 }
0x1f1e   :  { %v2681_v44 = vpop.eup %2680 }
0x1f1f   :  { %1676 = vrot.lane.b32.xlu0 %v2681_v44, %s2715_s25 }
0x1f20   :  { %v2683_v46 = vpop.eup %2682 }
0x1f21   :  { %v1670_v47 = vadd.f32 1.0, %v2683_v46  ;;  %v1995_v46 = vld [vmem:[%s3134_s7 + $0x8] sm:$0xff] }
0x1f23   :  { %2684 = vrcp.f32 %v1670_v47  ;;  %v1996_v47 = vld [vmem:[%s3134_s7 + $0x10] sm:$0xff] }
0x1f2d   :  { %v2685_v34 = vpop.eup %2684 }
0x1f2e   :  { %v1674_v50 = vmul.f32 %v2685_v34, %v1583_v36 }
0x1f91   :  { %v1677_v48 = vpop.permute.xlu0 %1676 }
0x1f92   :  { %v1679_v49 = vmul.f32 %v2685_v34, %v1677_v48  ;;  %v1997_v48 = vld [vmem:[%s3134_s7 + $0x18] sm:$0xff] }
0x1f94   :  { %1681 = vrot.lane.b32.xlu1 %v1679_v49, %s2716_s3  ;;  %v2577_v49 = vpack.c.bf16 %v1997_v48, %v1996_v47 }
0x2006   :  { %v1682_v51 = vpop.permute.xlu1 %1681 }
0x2007   :  { %v1684_v40 = vadd.f32 %v1682_v51, %v1674_v50 }
0x2009   :  { %2686 = vtanh.f32 %v1684_v40 }
0x2013   :  { %v2687_v53 = vpop.eup %2686 }
0x2014   :  { %1687 = vrot.lane.b32.xlu0 %v2687_v53, %s2715_s25 }
0x2086   :  { %v1688_v54 = vpop.permute.xlu0 %1687 }
0x2087   :  { %v1690_v57 = vmul.f32 %v2685_v34, %v1688_v54  ;;  %v2574_v34 = vpack.c.bf16 %v1995_v46, %v1994_v56  ;;  %v2133_v54 = vld [vmem:[%s3135_s8] ss:$0 sm:$0xff] }
0x2089   :  { %1693 = vrot.lane.b32.xlu1 %v1690_v57, %s2716_s3 }
0x20fb   :  { %v1694_v60 = vpop.permute.xlu1 %1693 }
0x20fc   :  { %2430 = vmatmul.mubr.msk.f32.vlgmr.msra.gmra.mrb[16].mxu1 %vm192_vm2, %v1694_v60 }
0x20fd   :  { %2569 = vmatpush3.bf16.msra.mxu1 %v2971_v52  ;;  %2451 = vmatprep.mubr.msk.f32.mxu1 %vm2713_vm1, %v2714_v4 }
0x20fe   :  { %2570 = vmatprep.subr.bf16.mxu1 %v2712_v0 }
0x2101   :  { %2572 = vmatpush3.bf16.msra.mxu1 %v2981_v55 }
0x21cf   :  { %v1763_v1 = vpop.f32.mrb[16].mxu1 }
0x21d0   :  { %v1767_v2 = vadd.f32 %v1763_v1, %v1170_v63  ;;  %v2431_v3 = vpop.f32.mrb[17].mxu1 }
0x21d2   :  { %2688 = vtanh.f32 %v1767_v2  ;;  %v2128_v6 = vmul.f32 -1.442695, %v1767_v2 }
0x21d4   :  { %2690 = vpow2.f32 %v2128_v6 }
0x21dc   :  { %v2689_v5 = vpop.eup %2688 }
0x21dd   :  { %1777 = vrot.lane.b32.xlu0 %v2689_v5, %s2715_s25 }
0x21de   :  { %v2691_v52 = vpop.eup %2690 }
0x21df   :  { %v1771_v7 = vadd.f32 1.0, %v2691_v52 }
0x21e1   :  { %2692 = vrcp.f32 %v1771_v7 }
0x21eb   :  { %v2693_v9 = vpop.eup %2692 }
0x21ec   :  { %v1775_v55 = vmul.f32 %v2693_v9, %v1684_v40 }
0x224f   :  { %v1778_v12 = vpop.permute.xlu0 %1777 }
0x2250   :  { %v1780_v10 = vmul.f32 %v2693_v9, %v1778_v12 }
0x2252   :  { %1782 = vrot.lane.b32.xlu1 %v1780_v10, %s2716_s3 }
0x22c4   :  { %v1783_v13 = vpop.permute.xlu1 %1782 }
0x22c5   :  { %v1785_v39 = vadd.f32 %v1783_v13, %v1775_v55 }
0x22c7   :  { %2694 = vtanh.f32 %v1785_v39 }
0x22d1   :  { %v2695_v61 = vpop.eup %2694 }
0x22d2   :  { %1788 = vrot.lane.b32.xlu0 %v2695_v61, %s2715_s25 }
0x2344   :  { %v1789_v11 = vpop.permute.xlu0 %1788 }
0x2345   :  { %v1791_v59 = vmul.f32 %v2693_v9, %v1789_v11 }
0x2347   :  { %1794 = vrot.lane.b32.xlu1 %v1791_v59, %s2716_s3 }
0x23b9   :  { %v1795_v14 = vpop.permute.xlu1 %1794 }
0x23ba   :  { %2441 = vmatmul.mubr.msk.f32.vlgmr.msra.gmra.mrb[26].mxu0 %vm192_vm2, %v1795_v14 }
0x23bb   :  { %2462 = vmatprep.mubr.msk.f32.mxu0 %vm2713_vm1, %v2714_v4  ;;  %2575 = vmatpush3.bf16.msra.mxu0 %v2574_v34 }
0x23bc   :  { %2576 = vmatprep.subr.bf16.mxu0 %v2712_v0 }
0x23bf   :  { %2578 = vmatpush3.bf16.msra.mxu0 %v2577_v49 }
0x248d   :  { %v1864_v15 = vpop.f32.mrb[26].mxu0 }
0x248e   :  { %v1868_v16 = vadd.f32 %v1864_v15, %v1175_v38  ;;  %v2442_v17 = vpop.f32.mrb[27].mxu0 }
0x2490   :  { %2696 = vtanh.f32 %v1868_v16  ;;  %v2130_v19 = vmul.f32 -1.442695, %v1868_v16 }
0x2492   :  { %2698 = vpow2.f32 %v2130_v19 }
0x249a   :  { %v2697_v18 = vpop.eup %2696 }
0x249b   :  { %1878 = vrot.lane.b32.xlu0 %v2697_v18, %s2715_s25 }
0x249c   :  { %v2699_v20 = vpop.eup %2698 }
0x249d   :  { %v1872_v21 = vadd.f32 1.0, %v2699_v20 }
0x249f   :  { %2700 = vrcp.f32 %v1872_v21 }
0x24a9   :  { %v2701_v22 = vpop.eup %2700 }
0x24aa   :  { %v1876_v4 = vmul.f32 %v2701_v22, %v1785_v39 }
0x250d   :  { %v1879_v23 = vpop.permute.xlu0 %1878 }
0x250e   :  { %v1881_v24 = vmul.f32 %v2701_v22, %v1879_v23 }
0x2510   :  { %1883 = vrot.lane.b32.xlu1 %v1881_v24, %s2716_s3 }
0x2582   :  { %v1884_v25 = vpop.permute.xlu1 %1883 }
0x2583   :  { %v1886_v58 = vadd.f32 %v1884_v25, %v1876_v4 }
0x2585   :  { %2702 = vtanh.f32 %v1886_v58 }
0x258f   :  { %v2703_v26 = vpop.eup %2702 }
0x2590   :  { %1889 = vrot.lane.b32.xlu0 %v2703_v26, %s2715_s25 }
0x2602   :  { %v1890_v27 = vpop.permute.xlu0 %1889 }
0x2603   :  { %v1892_v28 = vmul.f32 %v2701_v22, %v1890_v27 }
0x2605   :  { %1895 = vrot.lane.b32.xlu1 %v1892_v28, %s2716_s3 }
0x2677   :  { %v1896_v29 = vpop.permute.xlu1 %1895 }
0x2678   :  { %2452 = vmatmul.mubr.msk.f32.vlgmr.msra.gmra.mrb[18].mxu1 %vm192_vm2, %v1896_v29 }
0x274b   :  { %v1965_v31 = vpop.f32.mrb[18].mxu1 }
0x274c   :  { %v1969_v36 = vadd.f32 %v1965_v31, %v1180_v30  ;;  %v2453_v32 = vpop.f32.mrb[19].mxu1 }
0x274e   :  { %2704 = vtanh.f32 %v1969_v36  ;;  %v2132_v35 = vmul.f32 -1.442695, %v1969_v36 }
0x2750   :  { %2706 = vpow2.f32 %v2132_v35 }
0x2758   :  { %v2705_v33 = vpop.eup %2704 }
0x2759   :  { %1979 = vrot.lane.b32.xlu0 %v2705_v33, %s2715_s25 }
0x275a   :  { %v2707_v37 = vpop.eup %2706 }
0x275b   :  { %v1973_v41 = vadd.f32 1.0, %v2707_v37 }
0x275d   :  { %2708 = vrcp.f32 %v1973_v41 }
0x2767   :  { %v2709_v62 = vpop.eup %2708 }
0x2768   :  { %v1977_v44 = vmul.f32 %v2709_v62, %v1886_v58 }
0x27cb   :  { %v1980_v42 = vpop.permute.xlu0 %1979 }
0x27cc   :  { %v1982_v43 = vmul.f32 %v2709_v62, %v1980_v42 }
0x27ce   :  { %1984 = vrot.lane.b32.xlu1 %v1982_v43, %s2716_s3 }
0x2840   :  { %v1985_v45 = vpop.permute.xlu1 %1984 }
0x2841   :  { %v1987_v8 = vadd.f32 %v1985_v45, %v1977_v44 }
0x2843   :  { %2710 = vtanh.f32 %v1987_v8 }
0x284d   :  { %v2711_v50 = vpop.eup %2710 }
0x284e   :  { %1990 = vrot.lane.b32.xlu0 %v2711_v50, %s2715_s25 }
0x28c0   :  { %v1991_v51 = vpop.permute.xlu0 %1990 }
0x28c1   :  { %v1993_v40 = vmul.f32 %v2709_v62, %v1991_v51 }
0x28c3   :  { %2006 = vrot.lane.b32.xlu1 %v1993_v40, %s2716_s3 }
0x2935   :  { %v2007_v53 = vpop.permute.xlu1 %2006 }
0x2936   :  { %2463 = vmatmul.mubr.msk.f32.vlgmr.msra.gmra.mrb[28].mxu0 %vm192_vm2, %v2007_v53 }
0x2a09   :  { %v2076_v57 = vpop.f32.mrb[28].mxu0 }
0x2a0a   :  { %v2077_v60 = vadd.f32 %v2133_v54, %v2076_v57  ;;  %v2464_v63 = vpop.f32.mrb[29].mxu0 }
0x2a0c   :  { %2080 = vst [vmem:[%s3136_s9] sm:$0xff] %v2077_v60 }

</bundles_post_ra>
